<compile_context>
chip_gen: v7x
topology: tpu7x:2x2x1
jax: 0.10.0
libtpu: 0.0.40
codegen_flags: <defaults>
</compile_context>

<pallas_src>
import jax
import jax.numpy as jnp
import numpy as np
from jax.experimental import pallas as pl
from jax.experimental.pallas import tpu as pltpu


# ----------------------------- Pallas kernel --------------------------------

def make_encoder_kernel(seq_len, batch_p, hidden, n_layers):
    """Builds a fused encoder kernel (shapes baked in as Python constants)."""
    S, Bp, H = seq_len, batch_p, hidden

    def kernel(*refs):
        # inputs : x2d, lin_w, lin_b, (wih, whh, bias) * n_layers, h0, c0
        # outputs: h_n, c_n
        x_ref, lin_w_ref, lin_b_ref = refs[0:3]
        lstm_refs = refs[3:3 + 3 * n_layers]
        h0_ref, c0_ref, hN_ref, cN_ref = refs[3 + 3 * n_layers:]

        # 1) Embedding: Linear + ReLU (dropout = identity in eval mode).
        emb = jnp.maximum(
            jnp.dot(x_ref[...], lin_w_ref[...],
                    preferred_element_type=jnp.float32) + lin_b_ref[...],
            0.0)                                                   # (S*Bp, E)

        # Hoist all weight loads out of the recurrence.
        wih = [lstm_refs[3 * l][...] for l in range(n_layers)]       # (Din,4H)
        whh = [lstm_refs[3 * l + 1][...] for l in range(n_layers)]   # (H, 4H)
        bias = [lstm_refs[3 * l + 2][...] for l in range(n_layers)]  # (1, 4H)

        # 2) Hoisted non-recurrent input projection for layer 0: one big MXU
        #    matmul for the whole sequence.  With Bp=8 sublanes and 4H=128
        #    lanes, each per-step slice gx0[t*Bp:(t+1)*Bp, :] is exactly one
        #    tile-aligned vreg.
        gx0 = jnp.dot(emb, wih[0], preferred_element_type=jnp.float32) + bias[0]

        h = [h0_ref[l] for l in range(n_layers)]       # each (Bp, H)
        c = [c0_ref[l] for l in range(n_layers)]

        def cell(g, c_prev):
            # Gate columns permuted offline to [i, f, o | g]: one sigmoid pass
            # over 3H lanes + one tanh over H lanes (halves EUP work vs. full
            # sigmoid AND full tanh over all 4H lanes).
            sig = jax.nn.sigmoid(g[:, :3 * H])
            gg = jnp.tanh(g[:, 3 * H:])
            c_new = sig[:, H:2 * H] * c_prev + sig[:, :H] * gg
            h_new = sig[:, 2 * H:3 * H] * jnp.tanh(c_new)
            return h_new, c_new

        # 3) Wavefront over diagonals d = t + l, statically unrolled (S and
        #    n_layers are small): serial chain is S + L - 1 steps, and work
        #    from different layers on the same diagonal is independent.
        # TODO(synk): for large S, switch to lax.fori_loop(..., unroll=<small>)
        #             to cap vreg pressure of the static unroll.
        # TODO(synk): whh could be kept staged in the MXU across timesteps via
        #             pltpu.matmul_push_rhs / matmul_acc_lhs / matmul_pop.
        y_prev = [None] * n_layers     # layer outputs from the previous diagonal
        for d in range(S + n_layers - 1):
            y_new = list(y_prev)
            for l in range(n_layers):
                t = d - l
                if not (0 <= t < S):
                    continue
                if l == 0:
                    g = gx0[t * Bp:(t + 1) * Bp, :]
                else:
                    # Per-step input projection for upper layers (input only
                    # becomes available one diagonal earlier). Inter-layer
                    # dropout = identity in eval mode.
                    g = jnp.dot(y_prev[l - 1], wih[l],
                                preferred_element_type=jnp.float32) + bias[l]
                g = g + jnp.dot(h[l], whh[l],
                                preferred_element_type=jnp.float32)   # (Bp,4H)
                h[l], c[l] = cell(g, c[l])
                y_new[l] = h[l]
                # 4) Final states written exactly once per layer.
                if t == S - 1:
                    hN_ref[l] = h[l]
                    cN_ref[l] = c[l]
            y_prev = y_new

    return kernel


# ------------------------------ wrapper --------------------------------------

def _permute_gates(w):
    """Reorder LSTM gate columns from PyTorch's [i, f, g, o] to [i, f, o, g]."""
    i, f, g, o = jnp.split(w, 4, axis=-1)
    return jnp.concatenate([i, f, o, g], axis=-1)


def encoder_forward(x, hidden, params):
    """Pallas Encoder.forward: returns (h_n, c_n), each (n_layers, B, H)."""
    h0_all, c0_all = hidden
    S, B, I = x.shape
    n_layers, _, H = h0_all.shape
    E = params["lin_w_t"].shape[1]

    # Pad batch to a full sublane group (multiple of 8): a sub-vreg batch
    # wastes 6/8 sublanes of every vector op and MXU pass.  Padded rows carry
    # zeros, don't mix across batch, and are sliced off below.
    Bp = max(8, -(-B // 8) * 8)
    if Bp != B:
        pad = ((0, 0), (0, Bp - B), (0, 0))
        x = jnp.pad(x, pad)
        h0_all = jnp.pad(h0_all, pad)
        c0_all = jnp.pad(c0_all, pad)

    x2d = x.reshape(S * Bp, I)
    flat_lstm = []
    for wih_t, whh_t, b in params["lstm"]:
        flat_lstm += [_permute_gates(wih_t), _permute_gates(whh_t),
                      _permute_gates(b)]

    kernel = make_encoder_kernel(S, Bp, H, n_layers)
    # TODO(synk): at production batch sizes on v7x, add a leading "parallel"
    #             grid axis over batch tiles so both TensorCores are used.
    h_n, c_n = pl.pallas_call(
        kernel,
        out_shape=(
            jax.ShapeDtypeStruct((n_layers, Bp, H), jnp.float32),
            jax.ShapeDtypeStruct((n_layers, Bp, H), jnp.float32),
        ),
    )(x2d, params["lin_w_t"], params["lin_b"].reshape(1, E),
      *flat_lstm, h0_all, c0_all)
    return h_n[:, :B, :], c_n[:, :B, :]


# --------------------------- pure-JAX reference ------------------------------

def encoder_reference(x, hidden, params):
    h0_all, c0_all = hidden
    emb = jnp.maximum(
        jnp.einsum("sbi,ie->sbe", x, params["lin_w_t"]) + params["lin_b"], 0.0)
    layer_in = emb
    hs, cs = [], []
    for l in range(len(params["lstm"])):
        wih_t, whh_t, b = params["lstm"][l]
        H = whh_t.shape[0]
        h, c = h0_all[l], c0_all[l]
        outs = []
        for t in range(x.shape[0]):
            gates = layer_in[t] @ wih_t + h @ whh_t + b
            i_g = jax.nn.sigmoid(gates[:, 0 * H:1 * H])
            f_g = jax.nn.sigmoid(gates[:, 1 * H:2 * H])
            g_g = jnp.tanh(gates[:, 2 * H:3 * H])
            o_g = jax.nn.sigmoid(gates[:, 3 * H:4 * H])
            c = f_g * c + i_g * g_g
            h = o_g * jnp.tanh(c)
            outs.append(h)
        hs.append(h)
        cs.append(c)
        layer_in = jnp.stack(outs, axis=0)
    return jnp.stack(hs, axis=0), jnp.stack(cs, axis=0)


# ------------------------------ parameter init -------------------------------

def init_params(key, input_size, embedding_size, hidden_size, n_layers):
    ks = jax.random.split(key, 2 + 4 * n_layers)
    bound_lin = 1.0 / np.sqrt(input_size)
    params = {
        "lin_w_t": jax.random.uniform(ks[0], (input_size, embedding_size),
                                      jnp.float32, -bound_lin, bound_lin),
        "lin_b": jax.random.uniform(ks[1], (embedding_size,),
                                    jnp.float32, -bound_lin, bound_lin),
        "lstm": [],
    }
    bound = 1.0 / np.sqrt(hidden_size)
    for l in range(n_layers):
        d_in = embedding_size if l == 0 else hidden_size
        k0, k1, k2, k3 = ks[2 + 4 * l: 6 + 4 * l]
        wih_t = jax.random.uniform(k0, (d_in, 4 * hidden_size), jnp.float32, -bound, bound)
        whh_t = jax.random.uniform(k1, (hidden_size, 4 * hidden_size), jnp.float32, -bound, bound)
        b_ih = jax.random.uniform(k2, (4 * hidden_size,), jnp.float32, -bound, bound)
        b_hh = jax.random.uniform(k3, (4 * hidden_size,), jnp.float32, -bound, bound)
        params["lstm"].append((wih_t, whh_t, (b_ih + b_hh).reshape(1, 4 * hidden_size)))
    return params


# ----------------------------------- main ------------------------------------

if __name__ == "__main__":
    SEQ_LEN, BATCH = 8, 2
    INPUT_SIZE, EMBED_SIZE, HIDDEN_SIZE, N_LAYERS = 4, 32, 32, 2

    key = jax.random.PRNGKey(0)
    k_x, k_p = jax.random.split(key)
    x = jax.random.normal(k_x, (SEQ_LEN, BATCH, INPUT_SIZE), jnp.float32)
    h0 = jnp.zeros((N_LAYERS, BATCH, HIDDEN_SIZE), jnp.float32)
    c0 = jnp.zeros((N_LAYERS, BATCH, HIDDEN_SIZE), jnp.float32)
    params = init_params(k_p, INPUT_SIZE, EMBED_SIZE, HIDDEN_SIZE, N_LAYERS)

    h_n, c_n = encoder_forward(x, (h0, c0), params)
    jax.block_until_ready((h_n, c_n))

    h_ref, c_ref = encoder_reference(x, (h0, c0), params)
    np.testing.assert_allclose(np.asarray(h_n), np.asarray(h_ref), rtol=1e-5, atol=1e-5)
    np.testing.assert_allclose(np.asarray(c_n), np.asarray(c_ref), rtol=1e-5, atol=1e-5)

    print("KERNEL_OK")
</pallas_src>

<mosaic_0001>
module attributes {stable_mosaic.version = 11 : i64} {
  func.func @kernel(%arg0: memref<64x4xf32, #tpu.memory_space<vmem>>, %arg1: memref<4x32xf32, #tpu.memory_space<vmem>>, %arg2: memref<1x32xf32, #tpu.memory_space<vmem>>, %arg3: memref<32x128xf32, #tpu.memory_space<vmem>>, %arg4: memref<32x128xf32, #tpu.memory_space<vmem>>, %arg5: memref<1x128xf32, #tpu.memory_space<vmem>>, %arg6: memref<32x128xf32, #tpu.memory_space<vmem>>, %arg7: memref<32x128xf32, #tpu.memory_space<vmem>>, %arg8: memref<1x128xf32, #tpu.memory_space<vmem>>, %arg9: memref<2x8x32xf32, #tpu.memory_space<vmem>>, %arg10: memref<2x8x32xf32, #tpu.memory_space<vmem>>, %arg11: memref<2x8x32xf32, #tpu.memory_space<vmem>>, %arg12: memref<2x8x32xf32, #tpu.memory_space<vmem>>) attributes {dimension_semantics = [], scalar_prefetch = 0 : i64, scratch_operands = 0 : i64, tpu.core_type = #tpu.core_type<tc>} {
    %c0 = arith.constant 0 : index
    %c0_0 = arith.constant 0 : index
    %0 = vector.load %arg0[%c0, %c0_0] : memref<64x4xf32, #tpu.memory_space<vmem>>, vector<64x4xf32>
    %c0_1 = arith.constant 0 : index
    %c0_2 = arith.constant 0 : index
    %1 = vector.load %arg1[%c0_1, %c0_2] : memref<4x32xf32, #tpu.memory_space<vmem>>, vector<4x32xf32>
    %cst = arith.constant dense<0.000000e+00> : vector<64x32xf32>
    %2 = tpu.matmul %0, %1, %cst {dimension_numbers = #tpu.dot_dimension_numbers<[1], [0], [0], [1], [0, 0, 1, 1], [], []>} : vector<64x4xf32>, vector<4x32xf32>, vector<64x32xf32> -> vector<64x32xf32>
    %c0_3 = arith.constant 0 : index
    %c0_4 = arith.constant 0 : index
    %3 = vector.load %arg2[%c0_3, %c0_4] : memref<1x32xf32, #tpu.memory_space<vmem>>, vector<1x32xf32>
    %4 = vector.broadcast %3 : vector<1x32xf32> to vector<64x32xf32>
    %5 = arith.addf %2, %4 : vector<64x32xf32>
    %cst_5 = arith.constant 0.000000e+00 : f32
    %6 = vector.broadcast %cst_5 : f32 to vector<64x32xf32>
    %7 = arith.maximumf %5, %6 : vector<64x32xf32>
    %c0_6 = arith.constant 0 : index
    %c0_7 = arith.constant 0 : index
    %8 = vector.load %arg3[%c0_6, %c0_7] : memref<32x128xf32, #tpu.memory_space<vmem>>, vector<32x128xf32>
    %c0_8 = arith.constant 0 : index
    %c0_9 = arith.constant 0 : index
    %9 = vector.load %arg6[%c0_8, %c0_9] : memref<32x128xf32, #tpu.memory_space<vmem>>, vector<32x128xf32>
    %c0_10 = arith.constant 0 : index
    %c0_11 = arith.constant 0 : index
    %10 = vector.load %arg4[%c0_10, %c0_11] : memref<32x128xf32, #tpu.memory_space<vmem>>, vector<32x128xf32>
    %c0_12 = arith.constant 0 : index
    %c0_13 = arith.constant 0 : index
    %11 = vector.load %arg7[%c0_12, %c0_13] : memref<32x128xf32, #tpu.memory_space<vmem>>, vector<32x128xf32>
    %c0_14 = arith.constant 0 : index
    %c0_15 = arith.constant 0 : index
    %12 = vector.load %arg5[%c0_14, %c0_15] : memref<1x128xf32, #tpu.memory_space<vmem>>, vector<1x128xf32>
    %c0_16 = arith.constant 0 : index
    %c0_17 = arith.constant 0 : index
    %13 = vector.load %arg8[%c0_16, %c0_17] : memref<1x128xf32, #tpu.memory_space<vmem>>, vector<1x128xf32>
    %cst_18 = arith.constant dense<0.000000e+00> : vector<64x128xf32>
    %14 = tpu.matmul %7, %8, %cst_18 {dimension_numbers = #tpu.dot_dimension_numbers<[1], [0], [0], [1], [0, 0, 1, 1], [], []>} : vector<64x32xf32>, vector<32x128xf32>, vector<64x128xf32> -> vector<64x128xf32>
    %15 = vector.broadcast %12 : vector<1x128xf32> to vector<64x128xf32>
    %16 = arith.addf %14, %15 : vector<64x128xf32>
    %c0_19 = arith.constant 0 : index
    %c0_20 = arith.constant 0 : index
    %c0_21 = arith.constant 0 : index
    %17 = vector.load %arg9[%c0_19, %c0_20, %c0_21] : memref<2x8x32xf32, #tpu.memory_space<vmem>>, vector<1x8x32xf32>
    %18 = vector.shape_cast %17 : vector<1x8x32xf32> to vector<8x32xf32>
    %c1 = arith.constant 1 : index
    %c0_22 = arith.constant 0 : index
    %c0_23 = arith.constant 0 : index
    %19 = vector.load %arg9[%c1, %c0_22, %c0_23] : memref<2x8x32xf32, #tpu.memory_space<vmem>>, vector<1x8x32xf32>
    %20 = vector.shape_cast %19 : vector<1x8x32xf32> to vector<8x32xf32>
    %c0_24 = arith.constant 0 : index
    %c0_25 = arith.constant 0 : index
    %c0_26 = arith.constant 0 : index
    %21 = vector.load %arg10[%c0_24, %c0_25, %c0_26] : memref<2x8x32xf32, #tpu.memory_space<vmem>>, vector<1x8x32xf32>
    %22 = vector.shape_cast %21 : vector<1x8x32xf32> to vector<8x32xf32>
    %c1_27 = arith.constant 1 : index
    %c0_28 = arith.constant 0 : index
    %c0_29 = arith.constant 0 : index
    %23 = vector.load %arg10[%c1_27, %c0_28, %c0_29] : memref<2x8x32xf32, #tpu.memory_space<vmem>>, vector<1x8x32xf32>
    %24 = vector.shape_cast %23 : vector<1x8x32xf32> to vector<8x32xf32>
    %25 = vector.extract_strided_slice %16 {offsets = [0, 0], sizes = [8, 128], strides = [1, 1]} : vector<64x128xf32> to vector<8x128xf32>
    %cst_30 = arith.constant dense<0.000000e+00> : vector<8x128xf32>
    %26 = tpu.matmul %18, %10, %cst_30 {dimension_numbers = #tpu.dot_dimension_numbers<[1], [0], [0], [1], [0, 0, 1, 1], [], []>} : vector<8x32xf32>, vector<32x128xf32>, vector<8x128xf32> -> vector<8x128xf32>
    %27 = arith.addf %25, %26 : vector<8x128xf32>
    %28 = vector.extract_strided_slice %27 {offsets = [0, 0], sizes = [8, 96], strides = [1, 1]} : vector<8x128xf32> to vector<8x96xf32>
    %29 = arith.negf %28 : vector<8x96xf32>
    %30 = math.exp %29 : vector<8x96xf32>
    %cst_31 = arith.constant 1.000000e+00 : f32
    %31 = vector.broadcast %cst_31 : f32 to vector<8x96xf32>
    %32 = arith.addf %31, %30 : vector<8x96xf32>
    %33 = arith.divf %31, %32 : vector<8x96xf32>
    %34 = vector.extract_strided_slice %27 {offsets = [0, 96], sizes = [8, 32], strides = [1, 1]} : vector<8x128xf32> to vector<8x32xf32>
    %35 = math.tanh %34 : vector<8x32xf32>
    %36 = vector.extract_strided_slice %33 {offsets = [0, 32], sizes = [8, 32], strides = [1, 1]} : vector<8x96xf32> to vector<8x32xf32>
    %37 = arith.mulf %36, %22 : vector<8x32xf32>
    %38 = vector.extract_strided_slice %33 {offsets = [0, 0], sizes = [8, 32], strides = [1, 1]} : vector<8x96xf32> to vector<8x32xf32>
    %39 = arith.mulf %38, %35 : vector<8x32xf32>
    %40 = arith.addf %37, %39 : vector<8x32xf32>
    %41 = vector.extract_strided_slice %33 {offsets = [0, 64], sizes = [8, 32], strides = [1, 1]} : vector<8x96xf32> to vector<8x32xf32>
    %42 = math.tanh %40 : vector<8x32xf32>
    %43 = arith.mulf %41, %42 : vector<8x32xf32>
    %44 = vector.extract_strided_slice %16 {offsets = [8, 0], sizes = [8, 128], strides = [1, 1]} : vector<64x128xf32> to vector<8x128xf32>
    %cst_32 = arith.constant dense<0.000000e+00> : vector<8x128xf32>
    %45 = tpu.matmul %43, %10, %cst_32 {dimension_numbers = #tpu.dot_dimension_numbers<[1], [0], [0], [1], [0, 0, 1, 1], [], []>} : vector<8x32xf32>, vector<32x128xf32>, vector<8x128xf32> -> vector<8x128xf32>
    %46 = arith.addf %44, %45 : vector<8x128xf32>
    %47 = vector.extract_strided_slice %46 {offsets = [0, 0], sizes = [8, 96], strides = [1, 1]} : vector<8x128xf32> to vector<8x96xf32>
    %48 = arith.negf %47 : vector<8x96xf32>
    %49 = math.exp %48 : vector<8x96xf32>
    %cst_33 = arith.constant 1.000000e+00 : f32
    %50 = vector.broadcast %cst_33 : f32 to vector<8x96xf32>
    %51 = arith.addf %50, %49 : vector<8x96xf32>
    %52 = arith.divf %50, %51 : vector<8x96xf32>
    %53 = vector.extract_strided_slice %46 {offsets = [0, 96], sizes = [8, 32], strides = [1, 1]} : vector<8x128xf32> to vector<8x32xf32>
    %54 = math.tanh %53 : vector<8x32xf32>
    %55 = vector.extract_strided_slice %52 {offsets = [0, 32], sizes = [8, 32], strides = [1, 1]} : vector<8x96xf32> to vector<8x32xf32>
    %56 = arith.mulf %55, %40 : vector<8x32xf32>
    %57 = vector.extract_strided_slice %52 {offsets = [0, 0], sizes = [8, 32], strides = [1, 1]} : vector<8x96xf32> to vector<8x32xf32>
    %58 = arith.mulf %57, %54 : vector<8x32xf32>
    %59 = arith.addf %56, %58 : vector<8x32xf32>
    %60 = vector.extract_strided_slice %52 {offsets = [0, 64], sizes = [8, 32], strides = [1, 1]} : vector<8x96xf32> to vector<8x32xf32>
    %61 = math.tanh %59 : vector<8x32xf32>
    %62 = arith.mulf %60, %61 : vector<8x32xf32>
    %cst_34 = arith.constant dense<0.000000e+00> : vector<8x128xf32>
    %63 = tpu.matmul %43, %9, %cst_34 {dimension_numbers = #tpu.dot_dimension_numbers<[1], [0], [0], [1], [0, 0, 1, 1], [], []>} : vector<8x32xf32>, vector<32x128xf32>, vector<8x128xf32> -> vector<8x128xf32>
    %64 = vector.broadcast %13 : vector<1x128xf32> to vector<8x128xf32>
    %65 = arith.addf %63, %64 : vector<8x128xf32>
    %cst_35 = arith.constant dense<0.000000e+00> : vector<8x128xf32>
    %66 = tpu.matmul %20, %11, %cst_35 {dimension_numbers = #tpu.dot_dimension_numbers<[1], [0], [0], [1], [0, 0, 1, 1], [], []>} : vector<8x32xf32>, vector<32x128xf32>, vector<8x128xf32> -> vector<8x128xf32>
    %67 = arith.addf %65, %66 : vector<8x128xf32>
    %68 = vector.extract_strided_slice %67 {offsets = [0, 0], sizes = [8, 96], strides = [1, 1]} : vector<8x128xf32> to vector<8x96xf32>
    %69 = arith.negf %68 : vector<8x96xf32>
    %70 = math.exp %69 : vector<8x96xf32>
    %cst_36 = arith.constant 1.000000e+00 : f32
    %71 = vector.broadcast %cst_36 : f32 to vector<8x96xf32>
    %72 = arith.addf %71, %70 : vector<8x96xf32>
    %73 = arith.divf %71, %72 : vector<8x96xf32>
    %74 = vector.extract_strided_slice %67 {offsets = [0, 96], sizes = [8, 32], strides = [1, 1]} : vector<8x128xf32> to vector<8x32xf32>
    %75 = math.tanh %74 : vector<8x32xf32>
    %76 = vector.extract_strided_slice %73 {offsets = [0, 32], sizes = [8, 32], strides = [1, 1]} : vector<8x96xf32> to vector<8x32xf32>
    %77 = arith.mulf %76, %24 : vector<8x32xf32>
    %78 = vector.extract_strided_slice %73 {offsets = [0, 0], sizes = [8, 32], strides = [1, 1]} : vector<8x96xf32> to vector<8x32xf32>
    %79 = arith.mulf %78, %75 : vector<8x32xf32>
    %80 = arith.addf %77, %79 : vector<8x32xf32>
    %81 = vector.extract_strided_slice %73 {offsets = [0, 64], sizes = [8, 32], strides = [1, 1]} : vector<8x96xf32> to vector<8x32xf32>
    %82 = math.tanh %80 : vector<8x32xf32>
    %83 = arith.mulf %81, %82 : vector<8x32xf32>
    %84 = vector.extract_strided_slice %16 {offsets = [16, 0], sizes = [8, 128], strides = [1, 1]} : vector<64x128xf32> to vector<8x128xf32>
    %cst_37 = arith.constant dense<0.000000e+00> : vector<8x128xf32>
    %85 = tpu.matmul %62, %10, %cst_37 {dimension_numbers = #tpu.dot_dimension_numbers<[1], [0], [0], [1], [0, 0, 1, 1], [], []>} : vector<8x32xf32>, vector<32x128xf32>, vector<8x128xf32> -> vector<8x128xf32>
    %86 = arith.addf %84, %85 : vector<8x128xf32>
    %87 = vector.extract_strided_slice %86 {offsets = [0, 0], sizes = [8, 96], strides = [1, 1]} : vector<8x128xf32> to vector<8x96xf32>
    %88 = arith.negf %87 : vector<8x96xf32>
    %89 = math.exp %88 : vector<8x96xf32>
    %cst_38 = arith.constant 1.000000e+00 : f32
    %90 = vector.broadcast %cst_38 : f32 to vector<8x96xf32>
    %91 = arith.addf %90, %89 : vector<8x96xf32>
    %92 = arith.divf %90, %91 : vector<8x96xf32>
    %93 = vector.extract_strided_slice %86 {offsets = [0, 96], sizes = [8, 32], strides = [1, 1]} : vector<8x128xf32> to vector<8x32xf32>
    %94 = math.tanh %93 : vector<8x32xf32>
    %95 = vector.extract_strided_slice %92 {offsets = [0, 32], sizes = [8, 32], strides = [1, 1]} : vector<8x96xf32> to vector<8x32xf32>
    %96 = arith.mulf %95, %59 : vector<8x32xf32>
    %97 = vector.extract_strided_slice %92 {offsets = [0, 0], sizes = [8, 32], strides = [1, 1]} : vector<8x96xf32> to vector<8x32xf32>
    %98 = arith.mulf %97, %94 : vector<8x32xf32>
    %99 = arith.addf %96, %98 : vector<8x32xf32>
    %100 = vector.extract_strided_slice %92 {offsets = [0, 64], sizes = [8, 32], strides = [1, 1]} : vector<8x96xf32> to vector<8x32xf32>
    %101 = math.tanh %99 : vector<8x32xf32>
    %102 = arith.mulf %100, %101 : vector<8x32xf32>
    %cst_39 = arith.constant dense<0.000000e+00> : vector<8x128xf32>
    %103 = tpu.matmul %62, %9, %cst_39 {dimension_numbers = #tpu.dot_dimension_numbers<[1], [0], [0], [1], [0, 0, 1, 1], [], []>} : vector<8x32xf32>, vector<32x128xf32>, vector<8x128xf32> -> vector<8x128xf32>
    %104 = vector.broadcast %13 : vector<1x128xf32> to vector<8x128xf32>
    %105 = arith.addf %103, %104 : vector<8x128xf32>
    %cst_40 = arith.constant dense<0.000000e+00> : vector<8x128xf32>
    %106 = tpu.matmul %83, %11, %cst_40 {dimension_numbers = #tpu.dot_dimension_numbers<[1], [0], [0], [1], [0, 0, 1, 1], [], []>} : vector<8x32xf32>, vector<32x128xf32>, vector<8x128xf32> -> vector<8x128xf32>
    %107 = arith.addf %105, %106 : vector<8x128xf32>
    %108 = vector.extract_strided_slice %107 {offsets = [0, 0], sizes = [8, 96], strides = [1, 1]} : vector<8x128xf32> to vector<8x96xf32>
    %109 = arith.negf %108 : vector<8x96xf32>
    %110 = math.exp %109 : vector<8x96xf32>
    %cst_41 = arith.constant 1.000000e+00 : f32
    %111 = vector.broadcast %cst_41 : f32 to vector<8x96xf32>
    %112 = arith.addf %111, %110 : vector<8x96xf32>
    %113 = arith.divf %111, %112 : vector<8x96xf32>
    %114 = vector.extract_strided_slice %107 {offsets = [0, 96], sizes = [8, 32], strides = [1, 1]} : vector<8x128xf32> to vector<8x32xf32>
    %115 = math.tanh %114 : vector<8x32xf32>
    %116 = vector.extract_strided_slice %113 {offsets = [0, 32], sizes = [8, 32], strides = [1, 1]} : vector<8x96xf32> to vector<8x32xf32>
    %117 = arith.mulf %116, %80 : vector<8x32xf32>
    %118 = vector.extract_strided_slice %113 {offsets = [0, 0], sizes = [8, 32], strides = [1, 1]} : vector<8x96xf32> to vector<8x32xf32>
    %119 = arith.mulf %118, %115 : vector<8x32xf32>
    %120 = arith.addf %117, %119 : vector<8x32xf32>
    %121 = vector.extract_strided_slice %113 {offsets = [0, 64], sizes = [8, 32], strides = [1, 1]} : vector<8x96xf32> to vector<8x32xf32>
    %122 = math.tanh %120 : vector<8x32xf32>
    %123 = arith.mulf %121, %122 : vector<8x32xf32>
    %124 = vector.extract_strided_slice %16 {offsets = [24, 0], sizes = [8, 128], strides = [1, 1]} : vector<64x128xf32> to vector<8x128xf32>
    %cst_42 = arith.constant dense<0.000000e+00> : vector<8x128xf32>
    %125 = tpu.matmul %102, %10, %cst_42 {dimension_numbers = #tpu.dot_dimension_numbers<[1], [0], [0], [1], [0, 0, 1, 1], [], []>} : vector<8x32xf32>, vector<32x128xf32>, vector<8x128xf32> -> vector<8x128xf32>
    %126 = arith.addf %124, %125 : vector<8x128xf32>
    %127 = vector.extract_strided_slice %126 {offsets = [0, 0], sizes = [8, 96], strides = [1, 1]} : vector<8x128xf32> to vector<8x96xf32>
    %128 = arith.negf %127 : vector<8x96xf32>
    %129 = math.exp %128 : vector<8x96xf32>
    %cst_43 = arith.constant 1.000000e+00 : f32
    %130 = vector.broadcast %cst_43 : f32 to vector<8x96xf32>
    %131 = arith.addf %130, %129 : vector<8x96xf32>
    %132 = arith.divf %130, %131 : vector<8x96xf32>
    %133 = vector.extract_strided_slice %126 {offsets = [0, 96], sizes = [8, 32], strides = [1, 1]} : vector<8x128xf32> to vector<8x32xf32>
    %134 = math.tanh %133 : vector<8x32xf32>
    %135 = vector.extract_strided_slice %132 {offsets = [0, 32], sizes = [8, 32], strides = [1, 1]} : vector<8x96xf32> to vector<8x32xf32>
    %136 = arith.mulf %135, %99 : vector<8x32xf32>
    %137 = vector.extract_strided_slice %132 {offsets = [0, 0], sizes = [8, 32], strides = [1, 1]} : vector<8x96xf32> to vector<8x32xf32>
    %138 = arith.mulf %137, %134 : vector<8x32xf32>
    %139 = arith.addf %136, %138 : vector<8x32xf32>
    %140 = vector.extract_strided_slice %132 {offsets = [0, 64], sizes = [8, 32], strides = [1, 1]} : vector<8x96xf32> to vector<8x32xf32>
    %141 = math.tanh %139 : vector<8x32xf32>
    %142 = arith.mulf %140, %141 : vector<8x32xf32>
    %cst_44 = arith.constant dense<0.000000e+00> : vector<8x128xf32>
    %143 = tpu.matmul %102, %9, %cst_44 {dimension_numbers = #tpu.dot_dimension_numbers<[1], [0], [0], [1], [0, 0, 1, 1], [], []>} : vector<8x32xf32>, vector<32x128xf32>, vector<8x128xf32> -> vector<8x128xf32>
    %144 = vector.broadcast %13 : vector<1x128xf32> to vector<8x128xf32>
    %145 = arith.addf %143, %144 : vector<8x128xf32>
    %cst_45 = arith.constant dense<0.000000e+00> : vector<8x128xf32>
    %146 = tpu.matmul %123, %11, %cst_45 {dimension_numbers = #tpu.dot_dimension_numbers<[1], [0], [0], [1], [0, 0, 1, 1], [], []>} : vector<8x32xf32>, vector<32x128xf32>, vector<8x128xf32> -> vector<8x128xf32>
    %147 = arith.addf %145, %146 : vector<8x128xf32>
    %148 = vector.extract_strided_slice %147 {offsets = [0, 0], sizes = [8, 96], strides = [1, 1]} : vector<8x128xf32> to vector<8x96xf32>
    %149 = arith.negf %148 : vector<8x96xf32>
    %150 = math.exp %149 : vector<8x96xf32>
    %cst_46 = arith.constant 1.000000e+00 : f32
    %151 = vector.broadcast %cst_46 : f32 to vector<8x96xf32>
    %152 = arith.addf %151, %150 : vector<8x96xf32>
    %153 = arith.divf %151, %152 : vector<8x96xf32>
    %154 = vector.extract_strided_slice %147 {offsets = [0, 96], sizes = [8, 32], strides = [1, 1]} : vector<8x128xf32> to vector<8x32xf32>
    %155 = math.tanh %154 : vector<8x32xf32>
    %156 = vector.extract_strided_slice %153 {offsets = [0, 32], sizes = [8, 32], strides = [1, 1]} : vector<8x96xf32> to vector<8x32xf32>
    %157 = arith.mulf %156, %120 : vector<8x32xf32>
    %158 = vector.extract_strided_slice %153 {offsets = [0, 0], sizes = [8, 32], strides = [1, 1]} : vector<8x96xf32> to vector<8x32xf32>
    %159 = arith.mulf %158, %155 : vector<8x32xf32>
    %160 = arith.addf %157, %159 : vector<8x32xf32>
    %161 = vector.extract_strided_slice %153 {offsets = [0, 64], sizes = [8, 32], strides = [1, 1]} : vector<8x96xf32> to vector<8x32xf32>
    %162 = math.tanh %160 : vector<8x32xf32>
    %163 = arith.mulf %161, %162 : vector<8x32xf32>
    %164 = vector.extract_strided_slice %16 {offsets = [32, 0], sizes = [8, 128], strides = [1, 1]} : vector<64x128xf32> to vector<8x128xf32>
    %cst_47 = arith.constant dense<0.000000e+00> : vector<8x128xf32>
    %165 = tpu.matmul %142, %10, %cst_47 {dimension_numbers = #tpu.dot_dimension_numbers<[1], [0], [0], [1], [0, 0, 1, 1], [], []>} : vector<8x32xf32>, vector<32x128xf32>, vector<8x128xf32> -> vector<8x128xf32>
    %166 = arith.addf %164, %165 : vector<8x128xf32>
    %167 = vector.extract_strided_slice %166 {offsets = [0, 0], sizes = [8, 96], strides = [1, 1]} : vector<8x128xf32> to vector<8x96xf32>
    %168 = arith.negf %167 : vector<8x96xf32>
    %169 = math.exp %168 : vector<8x96xf32>
    %cst_48 = arith.constant 1.000000e+00 : f32
    %170 = vector.broadcast %cst_48 : f32 to vector<8x96xf32>
    %171 = arith.addf %170, %169 : vector<8x96xf32>
    %172 = arith.divf %170, %171 : vector<8x96xf32>
    %173 = vector.extract_strided_slice %166 {offsets = [0, 96], sizes = [8, 32], strides = [1, 1]} : vector<8x128xf32> to vector<8x32xf32>
    %174 = math.tanh %173 : vector<8x32xf32>
    %175 = vector.extract_strided_slice %172 {offsets = [0, 32], sizes = [8, 32], strides = [1, 1]} : vector<8x96xf32> to vector<8x32xf32>
    %176 = arith.mulf %175, %139 : vector<8x32xf32>
    %177 = vector.extract_strided_slice %172 {offsets = [0, 0], sizes = [8, 32], strides = [1, 1]} : vector<8x96xf32> to vector<8x32xf32>
    %178 = arith.mulf %177, %174 : vector<8x32xf32>
    %179 = arith.addf %176, %178 : vector<8x32xf32>
    %180 = vector.extract_strided_slice %172 {offsets = [0, 64], sizes = [8, 32], strides = [1, 1]} : vector<8x96xf32> to vector<8x32xf32>
    %181 = math.tanh %179 : vector<8x32xf32>
    %182 = arith.mulf %180, %181 : vector<8x32xf32>
    %cst_49 = arith.constant dense<0.000000e+00> : vector<8x128xf32>
    %183 = tpu.matmul %142, %9, %cst_49 {dimension_numbers = #tpu.dot_dimension_numbers<[1], [0], [0], [1], [0, 0, 1, 1], [], []>} : vector<8x32xf32>, vector<32x128xf32>, vector<8x128xf32> -> vector<8x128xf32>
    %184 = vector.broadcast %13 : vector<1x128xf32> to vector<8x128xf32>
    %185 = arith.addf %183, %184 : vector<8x128xf32>
    %cst_50 = arith.constant dense<0.000000e+00> : vector<8x128xf32>
    %186 = tpu.matmul %163, %11, %cst_50 {dimension_numbers = #tpu.dot_dimension_numbers<[1], [0], [0], [1], [0, 0, 1, 1], [], []>} : vector<8x32xf32>, vector<32x128xf32>, vector<8x128xf32> -> vector<8x128xf32>
    %187 = arith.addf %185, %186 : vector<8x128xf32>
    %188 = vector.extract_strided_slice %187 {offsets = [0, 0], sizes = [8, 96], strides = [1, 1]} : vector<8x128xf32> to vector<8x96xf32>
    %189 = arith.negf %188 : vector<8x96xf32>
    %190 = math.exp %189 : vector<8x96xf32>
    %cst_51 = arith.constant 1.000000e+00 : f32
    %191 = vector.broadcast %cst_51 : f32 to vector<8x96xf32>
    %192 = arith.addf %191, %190 : vector<8x96xf32>
    %193 = arith.divf %191, %192 : vector<8x96xf32>
    %194 = vector.extract_strided_slice %187 {offsets = [0, 96], sizes = [8, 32], strides = [1, 1]} : vector<8x128xf32> to vector<8x32xf32>
    %195 = math.tanh %194 : vector<8x32xf32>
    %196 = vector.extract_strided_slice %193 {offsets = [0, 32], sizes = [8, 32], strides = [1, 1]} : vector<8x96xf32> to vector<8x32xf32>
    %197 = arith.mulf %196, %160 : vector<8x32xf32>
    %198 = vector.extract_strided_slice %193 {offsets = [0, 0], sizes = [8, 32], strides = [1, 1]} : vector<8x96xf32> to vector<8x32xf32>
    %199 = arith.mulf %198, %195 : vector<8x32xf32>
    %200 = arith.addf %197, %199 : vector<8x32xf32>
    %201 = vector.extract_strided_slice %193 {offsets = [0, 64], sizes = [8, 32], strides = [1, 1]} : vector<8x96xf32> to vector<8x32xf32>
    %202 = math.tanh %200 : vector<8x32xf32>
    %203 = arith.mulf %201, %202 : vector<8x32xf32>
    %204 = vector.extract_strided_slice %16 {offsets = [40, 0], sizes = [8, 128], strides = [1, 1]} : vector<64x128xf32> to vector<8x128xf32>
    %cst_52 = arith.constant dense<0.000000e+00> : vector<8x128xf32>
    %205 = tpu.matmul %182, %10, %cst_52 {dimension_numbers = #tpu.dot_dimension_numbers<[1], [0], [0], [1], [0, 0, 1, 1], [], []>} : vector<8x32xf32>, vector<32x128xf32>, vector<8x128xf32> -> vector<8x128xf32>
    %206 = arith.addf %204, %205 : vector<8x128xf32>
    %207 = vector.extract_strided_slice %206 {offsets = [0, 0], sizes = [8, 96], strides = [1, 1]} : vector<8x128xf32> to vector<8x96xf32>
    %208 = arith.negf %207 : vector<8x96xf32>
    %209 = math.exp %208 : vector<8x96xf32>
    %cst_53 = arith.constant 1.000000e+00 : f32
    %210 = vector.broadcast %cst_53 : f32 to vector<8x96xf32>
    %211 = arith.addf %210, %209 : vector<8x96xf32>
    %212 = arith.divf %210, %211 : vector<8x96xf32>
    %213 = vector.extract_strided_slice %206 {offsets = [0, 96], sizes = [8, 32], strides = [1, 1]} : vector<8x128xf32> to vector<8x32xf32>
    %214 = math.tanh %213 : vector<8x32xf32>
    %215 = vector.extract_strided_slice %212 {offsets = [0, 32], sizes = [8, 32], strides = [1, 1]} : vector<8x96xf32> to vector<8x32xf32>
    %216 = arith.mulf %215, %179 : vector<8x32xf32>
    %217 = vector.extract_strided_slice %212 {offsets = [0, 0], sizes = [8, 32], strides = [1, 1]} : vector<8x96xf32> to vector<8x32xf32>
    %218 = arith.mulf %217, %214 : vector<8x32xf32>
    %219 = arith.addf %216, %218 : vector<8x32xf32>
    %220 = vector.extract_strided_slice %212 {offsets = [0, 64], sizes = [8, 32], strides = [1, 1]} : vector<8x96xf32> to vector<8x32xf32>
    %221 = math.tanh %219 : vector<8x32xf32>
    %222 = arith.mulf %220, %221 : vector<8x32xf32>
    %cst_54 = arith.constant dense<0.000000e+00> : vector<8x128xf32>
    %223 = tpu.matmul %182, %9, %cst_54 {dimension_numbers = #tpu.dot_dimension_numbers<[1], [0], [0], [1], [0, 0, 1, 1], [], []>} : vector<8x32xf32>, vector<32x128xf32>, vector<8x128xf32> -> vector<8x128xf32>
    %224 = vector.broadcast %13 : vector<1x128xf32> to vector<8x128xf32>
    %225 = arith.addf %223, %224 : vector<8x128xf32>
    %cst_55 = arith.constant dense<0.000000e+00> : vector<8x128xf32>
    %226 = tpu.matmul %203, %11, %cst_55 {dimension_numbers = #tpu.dot_dimension_numbers<[1], [0], [0], [1], [0, 0, 1, 1], [], []>} : vector<8x32xf32>, vector<32x128xf32>, vector<8x128xf32> -> vector<8x128xf32>
    %227 = arith.addf %225, %226 : vector<8x128xf32>
    %228 = vector.extract_strided_slice %227 {offsets = [0, 0], sizes = [8, 96], strides = [1, 1]} : vector<8x128xf32> to vector<8x96xf32>
    %229 = arith.negf %228 : vector<8x96xf32>
    %230 = math.exp %229 : vector<8x96xf32>
    %cst_56 = arith.constant 1.000000e+00 : f32
    %231 = vector.broadcast %cst_56 : f32 to vector<8x96xf32>
    %232 = arith.addf %231, %230 : vector<8x96xf32>
    %233 = arith.divf %231, %232 : vector<8x96xf32>
    %234 = vector.extract_strided_slice %227 {offsets = [0, 96], sizes = [8, 32], strides = [1, 1]} : vector<8x128xf32> to vector<8x32xf32>
    %235 = math.tanh %234 : vector<8x32xf32>
    %236 = vector.extract_strided_slice %233 {offsets = [0, 32], sizes = [8, 32], strides = [1, 1]} : vector<8x96xf32> to vector<8x32xf32>
    %237 = arith.mulf %236, %200 : vector<8x32xf32>
    %238 = vector.extract_strided_slice %233 {offsets = [0, 0], sizes = [8, 32], strides = [1, 1]} : vector<8x96xf32> to vector<8x32xf32>
    %239 = arith.mulf %238, %235 : vector<8x32xf32>
    %240 = arith.addf %237, %239 : vector<8x32xf32>
    %241 = vector.extract_strided_slice %233 {offsets = [0, 64], sizes = [8, 32], strides = [1, 1]} : vector<8x96xf32> to vector<8x32xf32>
    %242 = math.tanh %240 : vector<8x32xf32>
    %243 = arith.mulf %241, %242 : vector<8x32xf32>
    %244 = vector.extract_strided_slice %16 {offsets = [48, 0], sizes = [8, 128], strides = [1, 1]} : vector<64x128xf32> to vector<8x128xf32>
    %cst_57 = arith.constant dense<0.000000e+00> : vector<8x128xf32>
    %245 = tpu.matmul %222, %10, %cst_57 {dimension_numbers = #tpu.dot_dimension_numbers<[1], [0], [0], [1], [0, 0, 1, 1], [], []>} : vector<8x32xf32>, vector<32x128xf32>, vector<8x128xf32> -> vector<8x128xf32>
    %246 = arith.addf %244, %245 : vector<8x128xf32>
    %247 = vector.extract_strided_slice %246 {offsets = [0, 0], sizes = [8, 96], strides = [1, 1]} : vector<8x128xf32> to vector<8x96xf32>
    %248 = arith.negf %247 : vector<8x96xf32>
    %249 = math.exp %248 : vector<8x96xf32>
    %cst_58 = arith.constant 1.000000e+00 : f32
    %250 = vector.broadcast %cst_58 : f32 to vector<8x96xf32>
    %251 = arith.addf %250, %249 : vector<8x96xf32>
    %252 = arith.divf %250, %251 : vector<8x96xf32>
    %253 = vector.extract_strided_slice %246 {offsets = [0, 96], sizes = [8, 32], strides = [1, 1]} : vector<8x128xf32> to vector<8x32xf32>
    %254 = math.tanh %253 : vector<8x32xf32>
    %255 = vector.extract_strided_slice %252 {offsets = [0, 32], sizes = [8, 32], strides = [1, 1]} : vector<8x96xf32> to vector<8x32xf32>
    %256 = arith.mulf %255, %219 : vector<8x32xf32>
    %257 = vector.extract_strided_slice %252 {offsets = [0, 0], sizes = [8, 32], strides = [1, 1]} : vector<8x96xf32> to vector<8x32xf32>
    %258 = arith.mulf %257, %254 : vector<8x32xf32>
    %259 = arith.addf %256, %258 : vector<8x32xf32>
    %260 = vector.extract_strided_slice %252 {offsets = [0, 64], sizes = [8, 32], strides = [1, 1]} : vector<8x96xf32> to vector<8x32xf32>
    %261 = math.tanh %259 : vector<8x32xf32>
    %262 = arith.mulf %260, %261 : vector<8x32xf32>
    %cst_59 = arith.constant dense<0.000000e+00> : vector<8x128xf32>
    %263 = tpu.matmul %222, %9, %cst_59 {dimension_numbers = #tpu.dot_dimension_numbers<[1], [0], [0], [1], [0, 0, 1, 1], [], []>} : vector<8x32xf32>, vector<32x128xf32>, vector<8x128xf32> -> vector<8x128xf32>
    %264 = vector.broadcast %13 : vector<1x128xf32> to vector<8x128xf32>
    %265 = arith.addf %263, %264 : vector<8x128xf32>
    %cst_60 = arith.constant dense<0.000000e+00> : vector<8x128xf32>
    %266 = tpu.matmul %243, %11, %cst_60 {dimension_numbers = #tpu.dot_dimension_numbers<[1], [0], [0], [1], [0, 0, 1, 1], [], []>} : vector<8x32xf32>, vector<32x128xf32>, vector<8x128xf32> -> vector<8x128xf32>
    %267 = arith.addf %265, %266 : vector<8x128xf32>
    %268 = vector.extract_strided_slice %267 {offsets = [0, 0], sizes = [8, 96], strides = [1, 1]} : vector<8x128xf32> to vector<8x96xf32>
    %269 = arith.negf %268 : vector<8x96xf32>
    %270 = math.exp %269 : vector<8x96xf32>
    %cst_61 = arith.constant 1.000000e+00 : f32
    %271 = vector.broadcast %cst_61 : f32 to vector<8x96xf32>
    %272 = arith.addf %271, %270 : vector<8x96xf32>
    %273 = arith.divf %271, %272 : vector<8x96xf32>
    %274 = vector.extract_strided_slice %267 {offsets = [0, 96], sizes = [8, 32], strides = [1, 1]} : vector<8x128xf32> to vector<8x32xf32>
    %275 = math.tanh %274 : vector<8x32xf32>
    %276 = vector.extract_strided_slice %273 {offsets = [0, 32], sizes = [8, 32], strides = [1, 1]} : vector<8x96xf32> to vector<8x32xf32>
    %277 = arith.mulf %276, %240 : vector<8x32xf32>
    %278 = vector.extract_strided_slice %273 {offsets = [0, 0], sizes = [8, 32], strides = [1, 1]} : vector<8x96xf32> to vector<8x32xf32>
    %279 = arith.mulf %278, %275 : vector<8x32xf32>
    %280 = arith.addf %277, %279 : vector<8x32xf32>
    %281 = vector.extract_strided_slice %273 {offsets = [0, 64], sizes = [8, 32], strides = [1, 1]} : vector<8x96xf32> to vector<8x32xf32>
    %282 = math.tanh %280 : vector<8x32xf32>
    %283 = arith.mulf %281, %282 : vector<8x32xf32>
    %284 = vector.extract_strided_slice %16 {offsets = [56, 0], sizes = [8, 128], strides = [1, 1]} : vector<64x128xf32> to vector<8x128xf32>
    %cst_62 = arith.constant dense<0.000000e+00> : vector<8x128xf32>
    %285 = tpu.matmul %262, %10, %cst_62 {dimension_numbers = #tpu.dot_dimension_numbers<[1], [0], [0], [1], [0, 0, 1, 1], [], []>} : vector<8x32xf32>, vector<32x128xf32>, vector<8x128xf32> -> vector<8x128xf32>
    %286 = arith.addf %284, %285 : vector<8x128xf32>
    %287 = vector.extract_strided_slice %286 {offsets = [0, 0], sizes = [8, 96], strides = [1, 1]} : vector<8x128xf32> to vector<8x96xf32>
    %288 = arith.negf %287 : vector<8x96xf32>
    %289 = math.exp %288 : vector<8x96xf32>
    %cst_63 = arith.constant 1.000000e+00 : f32
    %290 = vector.broadcast %cst_63 : f32 to vector<8x96xf32>
    %291 = arith.addf %290, %289 : vector<8x96xf32>
    %292 = arith.divf %290, %291 : vector<8x96xf32>
    %293 = vector.extract_strided_slice %286 {offsets = [0, 96], sizes = [8, 32], strides = [1, 1]} : vector<8x128xf32> to vector<8x32xf32>
    %294 = math.tanh %293 : vector<8x32xf32>
    %295 = vector.extract_strided_slice %292 {offsets = [0, 32], sizes = [8, 32], strides = [1, 1]} : vector<8x96xf32> to vector<8x32xf32>
    %296 = arith.mulf %295, %259 : vector<8x32xf32>
    %297 = vector.extract_strided_slice %292 {offsets = [0, 0], sizes = [8, 32], strides = [1, 1]} : vector<8x96xf32> to vector<8x32xf32>
    %298 = arith.mulf %297, %294 : vector<8x32xf32>
    %299 = arith.addf %296, %298 : vector<8x32xf32>
    %300 = vector.extract_strided_slice %292 {offsets = [0, 64], sizes = [8, 32], strides = [1, 1]} : vector<8x96xf32> to vector<8x32xf32>
    %301 = math.tanh %299 : vector<8x32xf32>
    %302 = arith.mulf %300, %301 : vector<8x32xf32>
    %c0_64 = arith.constant 0 : index
    %c0_65 = arith.constant 0 : index
    %c0_66 = arith.constant 0 : index
    %303 = vector.load %arg11[%c0_64, %c0_65, %c0_66] : memref<2x8x32xf32, #tpu.memory_space<vmem>>, vector<1x8x32xf32>
    %304 = vector.shape_cast %303 : vector<1x8x32xf32> to vector<8x32xf32>
    %305 = vector.shape_cast %302 : vector<8x32xf32> to vector<1x8x32xf32>
    tpu.vector_store %arg11[%c0_64, %c0_65, %c0_66], %305 {strides = array<i32>} : memref<2x8x32xf32, #tpu.memory_space<vmem>>, vector<1x8x32xf32>,
    %c0_67 = arith.constant 0 : index
    %c0_68 = arith.constant 0 : index
    %c0_69 = arith.constant 0 : index
    %306 = vector.load %arg12[%c0_67, %c0_68, %c0_69] : memref<2x8x32xf32, #tpu.memory_space<vmem>>, vector<1x8x32xf32>
    %307 = vector.shape_cast %306 : vector<1x8x32xf32> to vector<8x32xf32>
    %308 = vector.shape_cast %299 : vector<8x32xf32> to vector<1x8x32xf32>
    tpu.vector_store %arg12[%c0_67, %c0_68, %c0_69], %308 {strides = array<i32>} : memref<2x8x32xf32, #tpu.memory_space<vmem>>, vector<1x8x32xf32>,
    %cst_70 = arith.constant dense<0.000000e+00> : vector<8x128xf32>
    %309 = tpu.matmul %262, %9, %cst_70 {dimension_numbers = #tpu.dot_dimension_numbers<[1], [0], [0], [1], [0, 0, 1, 1], [], []>} : vector<8x32xf32>, vector<32x128xf32>, vector<8x128xf32> -> vector<8x128xf32>
    %310 = vector.broadcast %13 : vector<1x128xf32> to vector<8x128xf32>
    %311 = arith.addf %309, %310 : vector<8x128xf32>
    %cst_71 = arith.constant dense<0.000000e+00> : vector<8x128xf32>
    %312 = tpu.matmul %283, %11, %cst_71 {dimension_numbers = #tpu.dot_dimension_numbers<[1], [0], [0], [1], [0, 0, 1, 1], [], []>} : vector<8x32xf32>, vector<32x128xf32>, vector<8x128xf32> -> vector<8x128xf32>
    %313 = arith.addf %311, %312 : vector<8x128xf32>
    %314 = vector.extract_strided_slice %313 {offsets = [0, 0], sizes = [8, 96], strides = [1, 1]} : vector<8x128xf32> to vector<8x96xf32>
    %315 = arith.negf %314 : vector<8x96xf32>
    %316 = math.exp %315 : vector<8x96xf32>
    %cst_72 = arith.constant 1.000000e+00 : f32
    %317 = vector.broadcast %cst_72 : f32 to vector<8x96xf32>
    %318 = arith.addf %317, %316 : vector<8x96xf32>
    %319 = arith.divf %317, %318 : vector<8x96xf32>
    %320 = vector.extract_strided_slice %313 {offsets = [0, 96], sizes = [8, 32], strides = [1, 1]} : vector<8x128xf32> to vector<8x32xf32>
    %321 = math.tanh %320 : vector<8x32xf32>
    %322 = vector.extract_strided_slice %319 {offsets = [0, 32], sizes = [8, 32], strides = [1, 1]} : vector<8x96xf32> to vector<8x32xf32>
    %323 = arith.mulf %322, %280 : vector<8x32xf32>
    %324 = vector.extract_strided_slice %319 {offsets = [0, 0], sizes = [8, 32], strides = [1, 1]} : vector<8x96xf32> to vector<8x32xf32>
    %325 = arith.mulf %324, %321 : vector<8x32xf32>
    %326 = arith.addf %323, %325 : vector<8x32xf32>
    %327 = vector.extract_strided_slice %319 {offsets = [0, 64], sizes = [8, 32], strides = [1, 1]} : vector<8x96xf32> to vector<8x32xf32>
    %328 = math.tanh %326 : vector<8x32xf32>
    %329 = arith.mulf %327, %328 : vector<8x32xf32>
    %cst_73 = arith.constant dense<0.000000e+00> : vector<8x128xf32>
    %330 = tpu.matmul %302, %9, %cst_73 {dimension_numbers = #tpu.dot_dimension_numbers<[1], [0], [0], [1], [0, 0, 1, 1], [], []>} : vector<8x32xf32>, vector<32x128xf32>, vector<8x128xf32> -> vector<8x128xf32>
    %331 = vector.broadcast %13 : vector<1x128xf32> to vector<8x128xf32>
    %332 = arith.addf %330, %331 : vector<8x128xf32>
    %cst_74 = arith.constant dense<0.000000e+00> : vector<8x128xf32>
    %333 = tpu.matmul %329, %11, %cst_74 {dimension_numbers = #tpu.dot_dimension_numbers<[1], [0], [0], [1], [0, 0, 1, 1], [], []>} : vector<8x32xf32>, vector<32x128xf32>, vector<8x128xf32> -> vector<8x128xf32>
    %334 = arith.addf %332, %333 : vector<8x128xf32>
    %335 = vector.extract_strided_slice %334 {offsets = [0, 0], sizes = [8, 96], strides = [1, 1]} : vector<8x128xf32> to vector<8x96xf32>
    %336 = arith.negf %335 : vector<8x96xf32>
    %337 = math.exp %336 : vector<8x96xf32>
    %cst_75 = arith.constant 1.000000e+00 : f32
    %338 = vector.broadcast %cst_75 : f32 to vector<8x96xf32>
    %339 = arith.addf %338, %337 : vector<8x96xf32>
    %340 = arith.divf %338, %339 : vector<8x96xf32>
    %341 = vector.extract_strided_slice %334 {offsets = [0, 96], sizes = [8, 32], strides = [1, 1]} : vector<8x128xf32> to vector<8x32xf32>
    %342 = math.tanh %341 : vector<8x32xf32>
    %343 = vector.extract_strided_slice %340 {offsets = [0, 32], sizes = [8, 32], strides = [1, 1]} : vector<8x96xf32> to vector<8x32xf32>
    %344 = arith.mulf %343, %326 : vector<8x32xf32>
    %345 = vector.extract_strided_slice %340 {offsets = [0, 0], sizes = [8, 32], strides = [1, 1]} : vector<8x96xf32> to vector<8x32xf32>
    %346 = arith.mulf %345, %342 : vector<8x32xf32>
    %347 = arith.addf %344, %346 : vector<8x32xf32>
    %348 = vector.extract_strided_slice %340 {offsets = [0, 64], sizes = [8, 32], strides = [1, 1]} : vector<8x96xf32> to vector<8x32xf32>
    %349 = math.tanh %347 : vector<8x32xf32>
    %350 = arith.mulf %348, %349 : vector<8x32xf32>
    %c1_76 = arith.constant 1 : index
    %c0_77 = arith.constant 0 : index
    %c0_78 = arith.constant 0 : index
    %351 = vector.load %arg11[%c1_76, %c0_77, %c0_78] : memref<2x8x32xf32, #tpu.memory_space<vmem>>, vector<1x8x32xf32>
    %352 = vector.shape_cast %351 : vector<1x8x32xf32> to vector<8x32xf32>
    %353 = vector.shape_cast %350 : vector<8x32xf32> to vector<1x8x32xf32>
    tpu.vector_store %arg11[%c1_76, %c0_77, %c0_78], %353 {strides = array<i32>} : memref<2x8x32xf32, #tpu.memory_space<vmem>>, vector<1x8x32xf32>,
    %c1_79 = arith.constant 1 : index
    %c0_80 = arith.constant 0 : index
    %c0_81 = arith.constant 0 : index
    %354 = vector.load %arg12[%c1_79, %c0_80, %c0_81] : memref<2x8x32xf32, #tpu.memory_space<vmem>>, vector<1x8x32xf32>
    %355 = vector.shape_cast %354 : vector<1x8x32xf32> to vector<8x32xf32>
    %356 = vector.shape_cast %347 : vector<8x32xf32> to vector<1x8x32xf32>
    tpu.vector_store %arg12[%c1_79, %c0_80, %c0_81], %356 {strides = array<i32>} : memref<2x8x32xf32, #tpu.memory_space<vmem>>, vector<1x8x32xf32>,
    return
  }
}

</mosaic_0001>

<bundles_post_ra>
// kernel: tpu_custom_call.1
= control target key start
LH: loop header
LB: loop body
LE: loop exit
PB: predicated region body
PF: predicated region fallthrough
CT: control target
= control target key end

     0   :  { %18 = vsyncpa [#allocation3], 0  ;;  %s4181_s0 = inlined_call_operand.vmem [shape: f32[64,4], index: 0, kind: input, shape index: {}]   ;;  %s4182_s1 = inlined_call_operand.hbm [shape: f32[4,32], index: 1, kind: input, shape index: {}]   ;;  %s4183_s2 = inlined_call_operand.vmem [shape: f32[1,32], index: 2, kind: input, shape index: {}]   ;;  %s4184_s3 = inlined_call_operand.vmem [shape: f32[32,128], index: 3, kind: input, shape index: {}]   ;;  %s4185_s4 = inlined_call_operand.vmem [shape: f32[32,128], index: 4, kind: input, shape index: {}]   ;;  %s4186_s5 = inlined_call_operand.vmem [shape: f32[1,128], index: 5, kind: input, shape index: {}]   ;;  %s4187_s6 = inlined_call_operand.hbm [shape: f32[32,128], index: 6, kind: input, shape index: {}]   ;;  %s4188_s7 = inlined_call_operand.hbm [shape: f32[32,128], index: 7, kind: input, shape index: {}]   ;;  %s4189_s8 = inlined_call_operand.hbm [shape: f32[1,128], index: 8, kind: input, shape index: {}]   ;;  %s4190_s9 = inlined_call_operand.vmem [shape: f32[2,8,32], index: 9, kind: input, shape index: {}]   ;;  %s4191_s10 = inlined_call_operand.vmem [shape: f32[2,8,32], index: 10, kind: input, shape index: {}]   ;;  %s4192_s11 = inlined_call_operand.hbm [shape: f32[2,8,32], index: 11, kind: output, shape index: {0}]   ;;  %s4193_s12 = inlined_call_operand.hbm [shape: f32[2,8,32], index: 12, kind: output, shape index: {1}]  }
   0x1   :  { %19 = vsyncpa [#allocation6], 0 }
   0x2   :  { %20 = vsyncpa [#allocation9], 0 }
   0x3   :  { %21 = vsyncpa [#allocation4], 0 }
   0x4   :  { %22 = vsyncpa [#allocation12], 0  ;;  %s3601_s21 = smov [#allocation5]   ;;  %s3459_s25 = scalar_lea.hbm %s4187_s6, 512 }
   0x5   :  { %s48_s22 = sshll.u32 %s3601_s21, 4  ;;  %p3460_p0 = scmp.ne.s32.totalorder %s4187_s6, %s3459_s25  ;;  %s49_s22 = int_to_ptr.vmem [resolvable:$true] %s48_s22 }
   0x6   :  { %p3463_p1 = scmp.lt.u32.totalorder %s3459_s25, %s4187_s6 }
   0x8   :  { %p3465_p2 = pnand %p3463_p1, %p3460_p0 }
   0xa   :  { %3468 = shalt.err (!%p3465_p2)
}
   0xb   :  { %s3469_s30 = scalar_lea.vmem %s49_s22, 512  ;;  %p3474_p4 = scmp.lt.s32.totalorder %s49_s22, %s49_s22 }
   0xc   :  { %p3470_p3 = scmp.ne.s32.totalorder %s49_s22, %s3469_s30  ;;  %p3475_p5 = scmp.lt.s32.totalorder %s3469_s30, %s3469_s30 }
   0xe   :  { %p3476_p6 = por %p3475_p5, %p3474_p4 }
  0x10   :  { %p3477_p7 = pnand %p3476_p6, %p3470_p3 }
  0x12   :  { %3480 = shalt.err (!%p3477_p7)
}
  0x13   :  { %s3602_s13 = smov 128   ;;  %s3603_s14 = smov 8  }
  0x14   :  { %54 = dma.hbm_to_vmem [thread:$0]  %s4187_s6, 512, %s49_s22, [#allocation6], %s3602_s13, %s3602_s13, %s3603_s14  }
  0x15   :  { %s3604_s17 = smov [#allocation2]   ;;  %s3605_s19 = smov [#allocation7]  }
  0x16   :  { %s31_s18 = sshll.u32 %s3604_s17, 4  ;;  %s60_s20 = sshll.u32 %s3605_s19, 4  ;;  %s32_s18 = int_to_ptr.vmem [resolvable:$true] %s31_s18  ;;  %s61_s20 = int_to_ptr.vmem [resolvable:$true] %s60_s20 }
  0x17   :  { %s3481_s24 = scalar_lea.hbm %s4182_s1, 64 }
  0x18   :  { %p3482_p8 = scmp.ne.s32.totalorder %s4182_s1, %s3481_s24  ;;  %p3485_p9 = scmp.lt.u32.totalorder %s3481_s24, %s4182_s1 }
  0x1a   :  { %p3487_p10 = pnand %p3485_p9, %p3482_p8 }
  0x1c   :  { %3490 = shalt.err (!%p3487_p10)
}
  0x1d   :  { %s3491_s6 = scalar_lea.vmem %s32_s18, 64  ;;  %p3496_p12 = scmp.lt.s32.totalorder %s32_s18, %s32_s18 }
  0x1e   :  { %p3492_p11 = scmp.ne.s32.totalorder %s32_s18, %s3491_s6  ;;  %p3497_p13 = scmp.lt.s32.totalorder %s3491_s6, %s3491_s6 }
  0x20   :  { %p3498_p0 = por %p3497_p13, %p3496_p12 }
  0x22   :  { %p3499_p1 = pnand %p3498_p0, %p3492_p11 }
  0x24   :  { %3502 = shalt.err (!%p3499_p1)
}
  0x25   :  { %34 = dma.hbm_to_vmem [thread:$0]  %s4182_s1, 64, %s32_s18, [#allocation3]  }
  0x26   :  { %s3503_s16 = scalar_lea.hbm %s4188_s7, 512 }
  0x27   :  { %p3504_p2 = scmp.ne.s32.totalorder %s4188_s7, %s3503_s16  ;;  %p3507_p3 = scmp.lt.u32.totalorder %s3503_s16, %s4188_s7 }
  0x29   :  { %p3509_p4 = pnand %p3507_p3, %p3504_p2 }
  0x2b   :  { %3512 = shalt.err (!%p3509_p4)
}
  0x2c   :  { %s3513_s24 = scalar_lea.vmem %s61_s20, 512  ;;  %p3518_p6 = scmp.lt.s32.totalorder %s61_s20, %s61_s20 }
  0x2d   :  { %p3514_p5 = scmp.ne.s32.totalorder %s61_s20, %s3513_s24  ;;  %p3519_p7 = scmp.lt.s32.totalorder %s3513_s24, %s3513_s24 }
  0x2f   :  { %p3520_p8 = por %p3519_p7, %p3518_p6 }
  0x31   :  { %p3521_p9 = pnand %p3520_p8, %p3514_p5 }
  0x33   :  { %3524 = shalt.err (!%p3521_p9)
}
  0x34   :  { %66 = dma.hbm_to_vmem [thread:$0]  %s4188_s7, 512, %s61_s20, [#allocation6], %s3602_s13, %s3602_s13, %s3603_s14  }
  0x35   :  { %s3606_s25 = smov [#allocation8]   ;;  %s3525_s6 = scalar_lea.hbm %s4189_s8, 16 }
  0x36   :  { %s73_s26 = sshll.u32 %s3606_s25, 4  ;;  %p3526_p10 = scmp.ne.s32.totalorder %s4189_s8, %s3525_s6  ;;  %s74_s26 = int_to_ptr.vmem [resolvable:$true] %s73_s26 }
  0x37   :  { %p3529_p11 = scmp.lt.u32.totalorder %s3525_s6, %s4189_s8 }
  0x39   :  { %p3531_p12 = pnand %p3529_p11, %p3526_p10 }
  0x3b   :  { %3534 = shalt.err (!%p3531_p12)
}
  0x3c   :  { %s3535_s16 = scalar_lea.vmem %s74_s26, 16  ;;  %s3539_s7 = scalar_lea.vmem %s74_s26, 32 }
  0x3d   :  { %p3536_p13 = scmp.ne.s32.totalorder %s74_s26, %s3535_s16  ;;  %p3540_p0 = scmp.lt.s32.totalorder %s74_s26, %s74_s26 }
  0x3e   :  { %p3541_p1 = scmp.lt.s32.totalorder %s3539_s7, %s3535_s16 }
  0x40   :  { %p3542_p2 = por %p3541_p1, %p3540_p0 }
  0x42   :  { %p3543_p3 = pnand %p3542_p2, %p3536_p13 }
  0x44   :  { %3546 = shalt.err (!%p3543_p3)
}
  0x45   :  { %76 = dma.hbm_to_vmem [thread:$0]  %s4189_s8, 16, %s74_s26, [#allocation9]  }
  0x46   :  { %3591 = dma.done.wait [#allocation3], 64  }
  0x47   :  { %3592 = vsyncadd [#allocation3], 4294967232 }
  0x48   :  { %3593 = dma.done.wait [#allocation6], 1024  }
  0x49   :  { %3594 = vsyncadd [#allocation6], 4294966272 }
  0x4a   :  { %3595 = dma.done.wait [#allocation9], 16  }
  0x4b   :  { %3596 = vsyncadd [#allocation9], 4294967280  ;;  %vm134_vm0 = vcmask 1043456   ;;  %vm109_vm1 = vcmask 31744   ;;  %v101_v0 = vld [vmem:[#allocation2] sm:$0xf] }
  0x4c   :  { %v93_v1 = vld [vmem:[%s4181_s0] sm:$0xff]  ;;  %v94_v2 = vld [vmem:[%s4181_s0 + $0x8] sm:$0xff]  ;;  %2843 = vmatprep.subr.msk.mxu0 %vm134_vm0, %v101_v0  ;;  %v95_v3 = vld [vmem:[%s4181_s0 + $0x10] sm:$0xff]  ;;  %v3607_v6 = vmov 0.0|0.0   ;;  %vm275_vm2 = vcmask 261120   ;;  %vm3608_vm3 = vmmov 0  }
  0x4d   :  { %2845 = vmatprep.mubr.msk.f32.mxu0 %vm109_vm1, %v93_v1  ;;  %v259_v4 = vld [vmem:[%s4185_s4] sm:$0xff]  ;;  %2844 = vmatpush3.msk.msra.mxu0 %vm134_vm0, %v101_v0  ;;  %v260_v5 = vld [vmem:[%s4185_s4 + $0x8] sm:$0xff]  ;;  %v96_v10 = vld [vmem:[%s4181_s0 + $0x18] sm:$0xff]  ;;  %v3609_v23 = vmov 0.0   ;;  %s3610_s30 = smov 32   ;;  %s3611_s16 = smov 64  }
  0x4e   :  { %2846 = vmatmul.mubr.msk.f32.vlgmr.msra.gmra.mrb[0].mxu0 %vm109_vm1, %v94_v2  ;;  %3149 = vmatprep.subr.bf16.mxu0 %v3607_v6  ;;  %v3752_v7 = vpack.c.bf16 %v260_v5, %v259_v4  ;;  %v251_v8 = vld [vmem:[%s4184_s3] sm:$0xff]  ;;  %v252_v9 = vld [vmem:[%s4184_s3 + $0x8] sm:$0xff]  ;;  %v253_v14 = vld [vmem:[%s4184_s3 + $0x10] sm:$0xff]  ;;  %s3613_s19 = smov [#allocation11]  }
  0x4f   :  { %2848 = vmatprep.mubr.msk.f32.mxu0 %vm109_vm1, %v95_v3  ;;  %v3141_v11 = vpack.c.bf16 %v252_v9, %v251_v8  ;;  %v97_v12 = vld [vmem:[%s4181_s0 + $0x20] sm:$0xff]  ;;  %v98_v13 = vld [vmem:[%s4181_s0 + $0x28] sm:$0xff]  ;;  %v254_v15 = vld [vmem:[%s4184_s3 + $0x18] sm:$0xff]  ;;  %s2622_s21 = sshll.u32 %s3613_s19, 4  ;;  %s2623_s21 = int_to_ptr.vmem [resolvable:$true] %s2622_s21 }
  0x50   :  { %3151 = vmatpush3.bf16.msra.mxu0 %v3752_v7  ;;  %v99_v16 = vld [vmem:[%s4181_s0 + $0x30] sm:$0xff]  ;;  %v3145_v17 = vpack.c.bf16 %v254_v15, %v253_v14  ;;  %v100_v18 = vld [vmem:[%s4181_s0 + $0x38] sm:$0xff]  ;;  %v405_v22 = vld [vmem:[%s4190_s9] sm:$0xff]  ;;  %s3547_s23 = scalar_lea.vmem %s2623_s21, 256  ;;  %p3552_p5 = scmp.lt.s32.totalorder %s2623_s21, %s2623_s21 }
  0x51   :  { %3142 = vmatprep.subr.bf16.mxu1 %v3141_v11  ;;  %3152 = vmatprep.subr.bf16.mxu0 %v3607_v6  ;;  %v261_v19 = vld [vmem:[%s4185_s4 + $0x10] sm:$0xff]  ;;  %v262_v20 = vld [vmem:[%s4185_s4 + $0x18] sm:$0xff]  ;;  %v2640_v24 = vld [vmem:[%s4183_s2] ss:$0 sm:$0xff]  ;;  %p3548_p4 = scmp.ne.s32.totalorder %s2623_s21, %s3547_s23  ;;  %p3553_p6 = scmp.lt.s32.totalorder %s3547_s23, %s3547_s23 }
  0x52   :  { %2849 = vmatmul.mubr.msk.f32.gmra.mrb[2].mxu0 %vm109_vm1, %v96_v10  ;;  %3144 = vmatpush3.bf16.msra.mxu1 %v3141_v11  ;;  %v3795_v21 = vpack.c.bf16 %v262_v20, %v261_v19  ;;  %v3828_v51 = vld [vmem:[%s4186_s5] ss:$0 sm:$0xff]  ;;  %v257_v14 = vld [vmem:[#allocation5 + $0x10] sm:$0xff] }
  0x53   :  { %2851 = vmatprep.mubr.msk.f32.mxu0 %vm109_vm1, %v97_v12  ;;  %3146 = vmatprep.subr.bf16.mxu1 %v3145_v17  ;;  %v408_v61 = vld [vmem:[%s4191_s10] sm:$0xff]  ;;  %p3554_p7 = por %p3553_p6, %p3552_p5 }
  0x54   :  { %3154 = vmatpush3.bf16.msra.mxu0 %v3795_v21  ;;  %v255_v12 = vld [vmem:[#allocation5] sm:$0xff] }
  0x55   :  { %3161 = vmatprep.subr.bf16.mxu0 %v3607_v6  ;;  %p3555_p8 = pnand %p3554_p7, %p3548_p4 }
  0x56   :  { %2852 = vmatmul.mubr.msk.f32.gmra.mrb[4].mxu0 %vm109_vm1, %v98_v13  ;;  %3148 = vmatpush3.bf16.msra.mxu1 %v3145_v17  ;;  %v256_v13 = vld [vmem:[#allocation5 + $0x8] sm:$0xff] }
  0x57   :  { %2854 = vmatprep.mubr.msk.f32.mxu0 %vm109_vm1, %v99_v16  ;;  %3155 = vmatprep.subr.bf16.mxu1 %v3607_v6  ;;  %v3854_v15 = vpack.c.bf16 %v256_v13, %v255_v12  ;;  %v258_v16 = vld [vmem:[#allocation5 + $0x18] sm:$0xff] }
  0x58   :  { %v3857_v17 = vpack.c.bf16 %v258_v16, %v257_v14 }
  0x5a   :  { %2855 = vmatmul.mubr.msk.f32.gmra.mrb[6].mxu0 %vm109_vm1, %v100_v18 }
  0x5b   :  { %2885 = vmatprep.mubr.msk.f32.mxu0 %vm3608_vm3, %v3609_v23 }
  0x5e   :  { %2886 = vmatmul.mubr.msk.f32.vlgmr.msra.gmra.mrb[8].mxu0 %vm275_vm2, %v405_v22  ;;  %v263_v22 = vld [vmem:[#allocation7] sm:$0xff] }
  0x5f   :  { %2907 = vmatprep.mubr.msk.f32.mxu0 %vm3608_vm3, %v3609_v23  ;;  %3163 = vmatpush3.bf16.msra.mxu0 %v3854_v15 }
  0x60   :  { %3164 = vmatprep.subr.bf16.mxu0 %v3607_v6 }
  0x63   :  { %3166 = vmatpush3.bf16.msra.mxu0 %v3857_v17 }
  0x64   :  { %3167 = vmatprep.subr.bf16.mxu0 %v3607_v6 }
 0x121   :  { %v2847_v25 = vpop.f32.mrb[0].mxu0 }
 0x122   :  { %v210_v26 = vadd.f32 %v2847_v25, %v2640_v24  ;;  %v204_v27 = vpop.f32.mrb[1].mxu0 }
 0x123   :  { %v205_v28 = vadd.f32 %v2640_v24, %v204_v27  ;;  %v266_v27 = vld [vmem:[#allocation7 + $0x18] sm:$0xff] }
 0x124   :  { %v244_v31 = vmax.f32 %v210_v26, 0.0  ;;  %v265_v26 = vld [vmem:[#allocation7 + $0x10] sm:$0xff] }
 0x125   :  { %v243_v29 = vmax.f32 %v205_v28, 0.0  ;;  %v2850_v30 = vpop.f32.mrb[2].mxu0 }
 0x126   :  { %v220_v32 = vadd.f32 %v2850_v30, %v2640_v24  ;;  %v214_v33 = vpop.f32.mrb[3].mxu0  ;;  %v2659_v30 = vld [vmem:[%s4190_s9 + $0x8] sm:$0xff] }
 0x127   :  { %2865 = vmatprep.mubr.msk.f32.mxu1 %vm275_vm2, %v243_v29  ;;  %v215_v34 = vadd.f32 %v2640_v24, %v214_v33  ;;  %v3869_v29 = vpack.c.bf16 %v266_v27, %v265_v26 }
 0x128   :  { %2866 = vmatmul.mubr.msk.f32.vlgmr.msra.gmra.mrb[0].mxu1 %vm275_vm2, %v244_v31  ;;  %v246_v35 = vmax.f32 %v220_v32, 0.0 }
 0x129   :  { %v245_v36 = vmax.f32 %v215_v34, 0.0  ;;  %v2853_v37 = vpop.f32.mrb[4].mxu0  ;;  %3157 = vmatpush3.bf16.msra.mxu1 %v3752_v7 }
 0x12a   :  { %v230_v38 = vadd.f32 %v2853_v37, %v2640_v24  ;;  %v224_v39 = vpop.f32.mrb[5].mxu0  ;;  %3158 = vmatprep.subr.bf16.mxu1 %v3607_v6 }
 0x12b   :  { %v225_v40 = vadd.f32 %v2640_v24, %v224_v39  ;;  %2868 = vmatprep.mubr.msk.f32.mxu1 %vm275_vm2, %v245_v36 }
 0x12c   :  { %v248_v41 = vmax.f32 %v230_v38, 0.0  ;;  %2869 = vmatmul.mubr.msk.f32.gmra.mrb[2].mxu1 %vm275_vm2, %v246_v35  ;;  %v3894_v35 = vld [vmem:[#allocation8] ss:$0 sm:$0xff] }
 0x12d   :  { %v247_v42 = vmax.f32 %v225_v40, 0.0  ;;  %3160 = vmatpush3.bf16.msra.mxu1 %v3795_v21  ;;  %v2856_v43 = vpop.f32.mrb[6].mxu0 }
 0x12e   :  { %3173 = vmatprep.subr.bf16.mxu1 %v3607_v6  ;;  %v240_v44 = vadd.f32 %v2856_v43, %v2640_v24  ;;  %v234_v45 = vpop.f32.mrb[7].mxu0 }
 0x12f   :  { %2871 = vmatprep.mubr.msk.f32.mxu1 %vm275_vm2, %v247_v42  ;;  %v235_v46 = vadd.f32 %v2640_v24, %v234_v45  ;;  %v264_v24 = vld [vmem:[#allocation7 + $0x8] sm:$0xff] }
 0x130   :  { %2872 = vmatmul.mubr.msk.f32.gmra.mrb[4].mxu1 %vm275_vm2, %v248_v41  ;;  %v250_v47 = vmax.f32 %v240_v44, 0.0  ;;  %v3864_v25 = vpack.c.bf16 %v264_v24, %v263_v22  ;;  %v2660_v41 = vld [vmem:[%s4191_s10 + $0x8] sm:$0xff]  ;;  %s3612_s10 = smov 96  }
 0x131   :  { %v249_v48 = vmax.f32 %v235_v46, 0.0  ;;  %v480_v49 = vpop.f32.mrb[8].mxu0 }
 0x132   :  { %v2887_v50 = vpop.f32.mrb[9].mxu0 }
 0x133   :  { %2874 = vmatprep.mubr.msk.f32.mxu1 %vm275_vm2, %v249_v48 }
 0x134   :  { %2875 = vmatmul.mubr.msk.f32.gmra.mrb[6].mxu1 %vm275_vm2, %v250_v47 }
 0x135   :  { %2896 = vmatprep.mubr.msk.f32.mxu1 %vm3608_vm3, %v3609_v23 }
 0x1fb   :  { %v3830_v52 = vpop.f32.mrb[0].mxu1 }
 0x1fc   :  { %v366_v53 = vpop.f32.mrb[1].mxu1  ;;  %v372_v31 = vadd.f32 %v3830_v52, %v3828_v51 }
 0x1fd   :  { %v367_v54 = vadd.f32 %v3828_v51, %v366_v53 }
 0x1ff   :  { %v484_v55 = vadd.f32 %v480_v49, %v367_v54  ;;  %v3833_v56 = vpop.f32.mrb[2].mxu1 }
 0x200   :  { %v3835_v57 = vpop.f32.mrb[3].mxu1 }
 0x201   :  { %3331 = vtanh.f32 %v484_v55  ;;  %v2662_v0 = vmul.f32 -1.442695, %v484_v55  ;;  %v377_v14 = vadd.f32 %v3828_v51, %v3835_v57 }
 0x203   :  { %v3837_v58 = vpop.f32.mrb[4].mxu1  ;;  %3333 = vpow2.f32 %v2662_v0 }
 0x204   :  { %v3839_v59 = vpop.f32.mrb[5].mxu1 }
 0x207   :  { %v3846_v62 = vpop.f32.mrb[6].mxu1 }
 0x208   :  { %v3848_v63 = vpop.f32.mrb[7].mxu1 }
 0x20b   :  { %v3332_v60 = vpop.eup %3331 }
 0x20c   :  { %498 = vrot.lane.b32.xlu0 %v3332_v60, %s3610_s30 }
 0x20d   :  { %v3334_v1 = vpop.eup %3333 }
 0x20e   :  { %v488_v2 = vadd.f32 1.0, %v3334_v1 }
 0x210   :  { %493 = vrot.lane.b32.xlu0 %v408_v61, %s3610_s30  ;;  %3335 = vrcp.f32 %v488_v2 }
 0x21a   :  { %v3336_v3 = vpop.eup %3335 }
 0x27e   :  { %v499_v4 = vpop.permute.xlu0 %498 }
 0x27f   :  { %v501_v5 = vmul.f32 %v3336_v3, %v499_v4 }
 0x281   :  { %503 = vrot.lane.b32.xlu1 %v501_v5, %s3610_s30 }
 0x282   :  { %v494_v8 = vpop.permute.xlu0 %493 }
 0x283   :  { %v496_v9 = vmul.f32 %v3336_v3, %v494_v8 }
 0x2f3   :  { %v504_v10 = vpop.permute.xlu1 %503 }
 0x2f4   :  { %v3851_v11 = vadd.f32 %v504_v10, %v496_v9 }
 0x2f6   :  { %3337 = vtanh.f32 %v3851_v11 }
 0x300   :  { %v3338_v18 = vpop.eup %3337 }
 0x301   :  { %509 = vrot.lane.b32.xlu1 %v3338_v18, %s3610_s30 }
 0x373   :  { %v510_v19 = vpop.permute.xlu1 %509 }
 0x374   :  { %v512_v20 = vmul.f32 %v3336_v3, %v510_v19 }
 0x376   :  { %514 = vrot.lane.b32.xlu0 %v512_v20, %s3611_s16 }
 0x3e8   :  { %v515_v28 = vpop.permute.xlu0 %514 }
 0x3e9   :  { %2897 = vmatmul.mubr.msk.f32.vlgmr.msra.gmra.mrb[8].mxu1 %vm275_vm2, %v515_v28  ;;  %2908 = vmatmul.mubr.msk.f32.vlgmr.msra.gmra.mrb[10].mxu0 %vm275_vm2, %v515_v28 }
 0x3ea   :  { %3169 = vmatpush3.bf16.msra.mxu0 %v3864_v25  ;;  %2918 = vmatprep.mubr.msk.f32.mxu0 %vm3608_vm3, %v3609_v23 }
 0x3eb   :  { %3170 = vmatprep.subr.bf16.mxu0 %v3607_v6  ;;  %3175 = vmatpush3.bf16.msra.mxu1 %v3752_v7 }
 0x3ec   :  { %3176 = vmatprep.subr.bf16.mxu1 %v3607_v6  ;;  %2929 = vmatprep.mubr.msk.f32.mxu1 %vm3608_vm3, %v3609_v23 }
 0x3ee   :  { %3172 = vmatpush3.bf16.msra.mxu0 %v3869_v29 }
 0x3ef   :  { %3178 = vmatpush3.bf16.msra.mxu1 %v3795_v21  ;;  %3191 = vmatprep.subr.bf16.mxu0 %v3607_v6 }
 0x3f0   :  { %3179 = vmatprep.subr.bf16.mxu1 %v3607_v6 }
 0x3f1   :  { %2919 = vmatmul.mubr.msk.f32.vlgmr.msra.gmra.mrb[10].mxu0 %vm275_vm2, %v2659_v30 }
 0x3f2   :  { %3193 = vmatpush3.bf16.msra.mxu0 %v3752_v7  ;;  %2962 = vmatprep.mubr.msk.f32.mxu0 %vm3608_vm3, %v3609_v23 }
 0x3f3   :  { %3194 = vmatprep.subr.bf16.mxu0 %v3607_v6 }
 0x3f6   :  { %3196 = vmatpush3.bf16.msra.mxu0 %v3795_v21 }
 0x3f7   :  { %3197 = vmatprep.subr.bf16.mxu0 %v3607_v6 }
 0x4bc   :  { %v584_v32 = vpop.f32.mrb[8].mxu1 }
 0x4bd   :  { %v588_v33 = vadd.f32 %v584_v32, %v372_v31  ;;  %v2898_v34 = vpop.f32.mrb[9].mxu1 }
 0x4bf   :  { %3339 = vtanh.f32 %v588_v33  ;;  %v2664_v42 = vmul.f32 -1.442695, %v588_v33 }
 0x4c4   :  { %v758_v36 = vpop.f32.mrb[10].mxu0 }
 0x4c5   :  { %v3293_v37 = vadd.f32 %v3894_v35, %v758_v36  ;;  %v2920_v38 = vpop.f32.mrb[11].mxu0 }
 0x4c7   :  { %3341 = vtanh.f32 %v3293_v37  ;;  %v2668_v43 = vmul.f32 -1.442695, %v3293_v37 }
 0x4c8   :  { %3343 = vpow2.f32 %v2664_v42 }
 0x4c9   :  { %v3340_v39 = vpop.eup %3339  ;;  %3345 = vpow2.f32 %v2668_v43 }
 0x4ca   :  { %598 = vrot.lane.b32.xlu1 %v3340_v39, %s3610_s30 }
 0x4d1   :  { %v3342_v40 = vpop.eup %3341 }
 0x4d2   :  { %776 = vrot.lane.b32.xlu0 %v3342_v40, %s3610_s30  ;;  %v3344_v44 = vpop.eup %3343 }
 0x4d3   :  { %v592_v45 = vadd.f32 1.0, %v3344_v44  ;;  %v3346_v46 = vpop.eup %3345 }
 0x4d4   :  { %v766_v47 = vadd.f32 1.0, %v3346_v46 }
 0x4d5   :  { %3347 = vrcp.f32 %v592_v45 }
 0x4d6   :  { %771 = vrot.lane.b32.xlu0 %v2660_v41, %s3610_s30  ;;  %3349 = vrcp.f32 %v766_v47 }
 0x4df   :  { %v3348_v48 = vpop.eup %3347 }
 0x4e0   :  { %v3350_v52 = vpop.eup %3349  ;;  %v596_v55 = vmul.f32 %v3348_v48, %v3851_v11 }
 0x53c   :  { %v599_v49 = vpop.permute.xlu1 %598 }
 0x53d   :  { %v601_v50 = vmul.f32 %v3348_v48, %v599_v49 }
 0x53f   :  { %603 = vrot.lane.b32.xlu1 %v601_v50, %s3610_s30 }
 0x544   :  { %v777_v53 = vpop.permute.xlu0 %776 }
 0x545   :  { %v779_v54 = vmul.f32 %v3350_v52, %v777_v53 }
 0x547   :  { %781 = vrot.lane.b32.xlu1 %v779_v54, %s3610_s30 }
 0x548   :  { %v772_v0 = vpop.permute.xlu0 %771 }
 0x549   :  { %v774_v1 = vmul.f32 %v3350_v52, %v772_v0 }
 0x5b1   :  { %v604_v60 = vpop.permute.xlu1 %603 }
 0x5b2   :  { %v3906_v61 = vadd.f32 %v604_v60, %v596_v55  ;;  %v382_v60 = vadd.f32 %v3833_v56, %v3828_v51 }
 0x5b4   :  { %3351 = vtanh.f32 %v3906_v61 }
 0x5b9   :  { %v782_v2 = vpop.permute.xlu1 %781 }
 0x5ba   :  { %v3909_v3 = vadd.f32 %v782_v2, %v774_v1 }
 0x5bc   :  { %3353 = vtanh.f32 %v3909_v3 }
 0x5be   :  { %v3352_v4 = vpop.eup %3351 }
 0x5bf   :  { %609 = vrot.lane.b32.xlu0 %v3352_v4, %s3610_s30 }
 0x5c6   :  { %v3354_v5 = vpop.eup %3353 }
 0x5c7   :  { %787 = vrot.lane.b32.xlu1 %v3354_v5, %s3610_s30 }
 0x631   :  { %v610_v8 = vpop.permute.xlu0 %609 }
 0x632   :  { %v612_v9 = vmul.f32 %v3348_v48, %v610_v8 }
 0x634   :  { %792 = vrot.lane.b32.xlu0 %v612_v9, %s3611_s16 }
 0x639   :  { %v788_v10 = vpop.permute.xlu1 %787 }
 0x63a   :  { %v790_v11 = vmul.f32 %v3350_v52, %v788_v10 }
 0x63c   :  { %962 = vrot.lane.b32.xlu1 %v790_v11, %s3611_s16 }
 0x6a6   :  { %v793_v12 = vpop.permute.xlu0 %792 }
 0x6a7   :  { %2930 = vmatmul.mubr.msk.f32.vlgmr.msra.gmra.mrb[10].mxu1 %vm275_vm2, %v793_v12 }
 0x6a8   :  { %3181 = vmatpush3.bf16.msra.mxu1 %v3854_v15  ;;  %2940 = vmatprep.mubr.msk.f32.mxu1 %vm3608_vm3, %v3609_v23 }
 0x6a9   :  { %3182 = vmatprep.subr.bf16.mxu1 %v3607_v6 }
 0x6ac   :  { %3184 = vmatpush3.bf16.msra.mxu1 %v3857_v17 }
 0x6ad   :  { %3185 = vmatprep.subr.bf16.mxu1 %v3607_v6 }
 0x6ae   :  { %v963_v13 = vpop.permute.xlu1 %962 }
 0x6af   :  { %2941 = vmatmul.mubr.msk.f32.vlgmr.msra.gmra.mrb[12].mxu1 %vm275_vm2, %v793_v12 }
 0x6b0   :  { %3187 = vmatpush3.bf16.msra.mxu1 %v3864_v25  ;;  %2951 = vmatprep.mubr.msk.f32.mxu1 %vm3608_vm3, %v3609_v23 }
 0x6b1   :  { %3188 = vmatprep.subr.bf16.mxu1 %v3607_v6 }
 0x6b4   :  { %3190 = vmatpush3.bf16.msra.mxu1 %v3869_v29 }
 0x6b5   :  { %3209 = vmatprep.subr.bf16.mxu1 %v3607_v6 }
 0x6b7   :  { %2952 = vmatmul.mubr.msk.f32.vlgmr.msra.gmra.mrb[12].mxu1 %vm275_vm2, %v963_v13 }
 0x6b8   :  { %3211 = vmatpush3.bf16.msra.mxu1 %v3752_v7  ;;  %2995 = vmatprep.mubr.msk.f32.mxu1 %vm3608_vm3, %v3609_v23 }
 0x6b9   :  { %3212 = vmatprep.subr.bf16.mxu1 %v3607_v6 }
 0x6bc   :  { %3214 = vmatpush3.bf16.msra.mxu1 %v3795_v21 }
 0x6bd   :  { %3215 = vmatprep.subr.bf16.mxu1 %v3607_v6 }
 0x77a   :  { %v862_v16 = vpop.f32.mrb[10].mxu1 }
 0x77b   :  { %v866_v18 = vadd.f32 %v862_v16, %v377_v14  ;;  %v2931_v19 = vpop.f32.mrb[11].mxu1 }
 0x77d   :  { %3355 = vtanh.f32 %v866_v18  ;;  %v2670_v28 = vmul.f32 -1.442695, %v866_v18 }
 0x787   :  { %v3356_v20 = vpop.eup %3355 }
 0x788   :  { %876 = vrot.lane.b32.xlu0 %v3356_v20, %s3610_s30 }
 0x78a   :  { %v1032_v22 = vpop.f32.mrb[12].mxu1 }
 0x78b   :  { %v3294_v24 = vadd.f32 %v3894_v35, %v1032_v22  ;;  %v2953_v26 = vpop.f32.mrb[13].mxu1 }
 0x78d   :  { %3357 = vtanh.f32 %v3294_v24  ;;  %v2673_v31 = vmul.f32 -1.442695, %v3294_v24 }
 0x78e   :  { %3359 = vpow2.f32 %v2670_v28 }
 0x78f   :  { %3361 = vpow2.f32 %v2673_v31 }
 0x797   :  { %v3358_v27 = vpop.eup %3357 }
 0x798   :  { %1046 = vrot.lane.b32.xlu1 %v3358_v27, %s3610_s30  ;;  %v3360_v30 = vpop.eup %3359 }
 0x799   :  { %v870_v57 = vadd.f32 1.0, %v3360_v30  ;;  %v3362_v32 = vpop.eup %3361 }
 0x79a   :  { %v1040_v37 = vadd.f32 1.0, %v3362_v32 }
 0x79b   :  { %3363 = vrcp.f32 %v870_v57 }
 0x79c   :  { %3365 = vrcp.f32 %v1040_v37 }
 0x7a5   :  { %v3364_v33 = vpop.eup %3363 }
 0x7a6   :  { %v3366_v38 = vpop.eup %3365  ;;  %v874_v41 = vmul.f32 %v3364_v33, %v3906_v61 }
 0x7a7   :  { %v1044_v45 = vmul.f32 %v3366_v38, %v3909_v3 }
 0x7fa   :  { %v877_v34 = vpop.permute.xlu0 %876 }
 0x7fb   :  { %v879_v36 = vmul.f32 %v3364_v33, %v877_v34 }
 0x7fd   :  { %881 = vrot.lane.b32.xlu0 %v879_v36, %s3610_s30 }
 0x80a   :  { %v1047_v39 = vpop.permute.xlu1 %1046 }
 0x80b   :  { %v1049_v40 = vmul.f32 %v3366_v38, %v1047_v39 }
 0x80d   :  { %1051 = vrot.lane.b32.xlu1 %v1049_v40, %s3610_s30  ;;  %v387_v40 = vadd.f32 %v3828_v51, %v3839_v59 }
 0x86f   :  { %v882_v42 = vpop.permute.xlu0 %881 }
 0x870   :  { %v3945_v43 = vadd.f32 %v882_v42, %v874_v41 }
 0x872   :  { %3367 = vtanh.f32 %v3945_v43 }
 0x87c   :  { %v3368_v44 = vpop.eup %3367 }
 0x87d   :  { %887 = vrot.lane.b32.xlu0 %v3368_v44, %s3610_s30 }
 0x87f   :  { %v1052_v46 = vpop.permute.xlu1 %1051 }
 0x880   :  { %v3950_v47 = vadd.f32 %v1052_v46, %v1044_v45 }
 0x882   :  { %3369 = vtanh.f32 %v3950_v47 }
 0x88c   :  { %v3370_v48 = vpop.eup %3369 }
 0x88d   :  { %1057 = vrot.lane.b32.xlu1 %v3370_v48, %s3610_s30 }
 0x8ef   :  { %v888_v49 = vpop.permute.xlu0 %887 }
 0x8f0   :  { %v890_v50 = vmul.f32 %v3364_v33, %v888_v49 }
 0x8f2   :  { %1062 = vrot.lane.b32.xlu0 %v890_v50, %s3611_s16 }
 0x8ff   :  { %v1058_v52 = vpop.permute.xlu1 %1057 }
 0x900   :  { %v1060_v53 = vmul.f32 %v3366_v38, %v1058_v52 }
 0x902   :  { %1232 = vrot.lane.b32.xlu1 %v1060_v53, %s3611_s16 }
 0x964   :  { %v1063_v54 = vpop.permute.xlu0 %1062 }
 0x965   :  { %2963 = vmatmul.mubr.msk.f32.vlgmr.msra.gmra.mrb[12].mxu0 %vm275_vm2, %v1063_v54 }
 0x966   :  { %3199 = vmatpush3.bf16.msra.mxu0 %v3854_v15  ;;  %2973 = vmatprep.mubr.msk.f32.mxu0 %vm3608_vm3, %v3609_v23 }
 0x967   :  { %3200 = vmatprep.subr.bf16.mxu0 %v3607_v6 }
 0x96a   :  { %3202 = vmatpush3.bf16.msra.mxu0 %v3857_v17 }
 0x96b   :  { %3203 = vmatprep.subr.bf16.mxu0 %v3607_v6 }
 0x96d   :  { %2974 = vmatmul.mubr.msk.f32.vlgmr.msra.gmra.mrb[14].mxu0 %vm275_vm2, %v1063_v54 }
 0x96e   :  { %3205 = vmatpush3.bf16.msra.mxu0 %v3864_v25  ;;  %2984 = vmatprep.mubr.msk.f32.mxu0 %vm3608_vm3, %v3609_v23 }
 0x96f   :  { %3206 = vmatprep.subr.bf16.mxu0 %v3607_v6 }
 0x972   :  { %3208 = vmatpush3.bf16.msra.mxu0 %v3869_v29 }
 0x973   :  { %3227 = vmatprep.subr.bf16.mxu0 %v3607_v6 }
 0x974   :  { %v1233_v55 = vpop.permute.xlu1 %1232 }
 0x975   :  { %2985 = vmatmul.mubr.msk.f32.vlgmr.msra.gmra.mrb[14].mxu0 %vm275_vm2, %v1233_v55 }
 0x976   :  { %3229 = vmatpush3.bf16.msra.mxu0 %v3752_v7  ;;  %3028 = vmatprep.mubr.msk.f32.mxu0 %vm3608_vm3, %v3609_v23 }
 0x977   :  { %3230 = vmatprep.subr.bf16.mxu0 %v3607_v6 }
 0x97a   :  { %3232 = vmatpush3.bf16.msra.mxu0 %v3795_v21 }
 0x97b   :  { %3233 = vmatprep.subr.bf16.mxu0 %v3607_v6 }
 0xa38   :  { %v1132_v61 = vpop.f32.mrb[12].mxu0 }
 0xa39   :  { %v1136_v0 = vadd.f32 %v1132_v61, %v382_v60  ;;  %v2964_v1 = vpop.f32.mrb[13].mxu0 }
 0xa3b   :  { %3371 = vtanh.f32 %v1136_v0  ;;  %v2675_v9 = vmul.f32 -1.442695, %v1136_v0 }
 0xa45   :  { %v3372_v2 = vpop.eup %3371 }
 0xa46   :  { %1146 = vrot.lane.b32.xlu0 %v3372_v2, %s3610_s30 }
 0xa48   :  { %v1302_v3 = vpop.f32.mrb[14].mxu0 }
 0xa49   :  { %v3295_v4 = vadd.f32 %v3894_v35, %v1302_v3  ;;  %v2986_v5 = vpop.f32.mrb[15].mxu0 }
 0xa4b   :  { %3373 = vtanh.f32 %v3295_v4  ;;  %v2678_v11 = vmul.f32 -1.442695, %v3295_v4 }
 0xa4c   :  { %3375 = vpow2.f32 %v2675_v9 }
 0xa4d   :  { %3377 = vpow2.f32 %v2678_v11 }
 0xa55   :  { %v3374_v8 = vpop.eup %3373 }
 0xa56   :  { %1316 = vrot.lane.b32.xlu1 %v3374_v8, %s3610_s30  ;;  %v3376_v10 = vpop.eup %3375 }
 0xa57   :  { %v1140_v56 = vadd.f32 1.0, %v3376_v10  ;;  %v3378_v12 = vpop.eup %3377 }
 0xa58   :  { %v1310_v18 = vadd.f32 1.0, %v3378_v12 }
 0xa59   :  { %3379 = vrcp.f32 %v1140_v56 }
 0xa5a   :  { %3381 = vrcp.f32 %v1310_v18 }
 0xa63   :  { %v3380_v13 = vpop.eup %3379 }
 0xa64   :  { %v3382_v19 = vpop.eup %3381  ;;  %v1144_v24 = vmul.f32 %v3380_v13, %v3945_v43 }
 0xa65   :  { %v1314_v30 = vmul.f32 %v3382_v19, %v3950_v47 }
 0xab8   :  { %v1147_v14 = vpop.permute.xlu0 %1146 }
 0xab9   :  { %v1149_v16 = vmul.f32 %v3380_v13, %v1147_v14 }
 0xabb   :  { %1151 = vrot.lane.b32.xlu0 %v1149_v16, %s3610_s30 }
 0xac8   :  { %v1317_v20 = vpop.permute.xlu1 %1316 }
 0xac9   :  { %v1319_v22 = vmul.f32 %v3382_v19, %v1317_v20  ;;  %v392_v20 = vadd.f32 %v3837_v58, %v3828_v51 }
 0xacb   :  { %1321 = vrot.lane.b32.xlu1 %v1319_v22, %s3610_s30 }
 0xb2d   :  { %v1152_v26 = vpop.permute.xlu0 %1151 }
 0xb2e   :  { %v3985_v27 = vadd.f32 %v1152_v26, %v1144_v24 }
 0xb30   :  { %3383 = vtanh.f32 %v3985_v27 }
 0xb3a   :  { %v3384_v28 = vpop.eup %3383 }
 0xb3b   :  { %1157 = vrot.lane.b32.xlu0 %v3384_v28, %s3610_s30 }
 0xb3d   :  { %v1322_v31 = vpop.permute.xlu1 %1321 }
 0xb3e   :  { %v3990_v57 = vadd.f32 %v1322_v31, %v1314_v30 }
 0xb40   :  { %3385 = vtanh.f32 %v3990_v57 }
 0xb4a   :  { %v3386_v32 = vpop.eup %3385 }
 0xb4b   :  { %1327 = vrot.lane.b32.xlu1 %v3386_v32, %s3610_s30 }
 0xbad   :  { %v1158_v33 = vpop.permute.xlu0 %1157 }
 0xbae   :  { %v1160_v34 = vmul.f32 %v3380_v13, %v1158_v33 }
 0xbb0   :  { %1332 = vrot.lane.b32.xlu0 %v1160_v34, %s3611_s16 }
 0xbbd   :  { %v1328_v36 = vpop.permute.xlu1 %1327 }
 0xbbe   :  { %v1330_v37 = vmul.f32 %v3382_v19, %v1328_v36 }
 0xbc0   :  { %1502 = vrot.lane.b32.xlu1 %v1330_v37, %s3611_s16 }
 0xc22   :  { %v1333_v38 = vpop.permute.xlu0 %1332 }
 0xc23   :  { %2996 = vmatmul.mubr.msk.f32.vlgmr.msra.gmra.mrb[14].mxu1 %vm275_vm2, %v1333_v38 }
 0xc24   :  { %3217 = vmatpush3.bf16.msra.mxu1 %v3854_v15  ;;  %3006 = vmatprep.mubr.msk.f32.mxu1 %vm3608_vm3, %v3609_v23 }
 0xc25   :  { %3218 = vmatprep.subr.bf16.mxu1 %v3607_v6 }
 0xc28   :  { %3220 = vmatpush3.bf16.msra.mxu1 %v3857_v17 }
 0xc29   :  { %3221 = vmatprep.subr.bf16.mxu1 %v3607_v6 }
 0xc2b   :  { %3007 = vmatmul.mubr.msk.f32.vlgmr.msra.gmra.mrb[16].mxu1 %vm275_vm2, %v1333_v38 }
 0xc2c   :  { %3223 = vmatpush3.bf16.msra.mxu1 %v3864_v25  ;;  %3017 = vmatprep.mubr.msk.f32.mxu1 %vm3608_vm3, %v3609_v23 }
 0xc2d   :  { %3224 = vmatprep.subr.bf16.mxu1 %v3607_v6 }
 0xc30   :  { %3226 = vmatpush3.bf16.msra.mxu1 %v3869_v29 }
 0xc31   :  { %3245 = vmatprep.subr.bf16.mxu1 %v3607_v6 }
 0xc32   :  { %v1503_v39 = vpop.permute.xlu1 %1502 }
 0xc33   :  { %3018 = vmatmul.mubr.msk.f32.vlgmr.msra.gmra.mrb[16].mxu1 %vm275_vm2, %v1503_v39 }
 0xc34   :  { %3247 = vmatpush3.bf16.msra.mxu1 %v3752_v7  ;;  %3061 = vmatprep.mubr.msk.f32.mxu1 %vm3608_vm3, %v3609_v23 }
 0xc35   :  { %3248 = vmatprep.subr.bf16.mxu1 %v3607_v6 }
 0xc38   :  { %3250 = vmatpush3.bf16.msra.mxu1 %v3795_v21 }
 0xc39   :  { %3251 = vmatprep.subr.bf16.mxu1 %v3607_v6 }
 0xcf6   :  { %v1402_v41 = vpop.f32.mrb[14].mxu1 }
 0xcf7   :  { %v1406_v42 = vadd.f32 %v1402_v41, %v387_v40  ;;  %v2997_v43 = vpop.f32.mrb[15].mxu1 }
 0xcf9   :  { %3387 = vtanh.f32 %v1406_v42  ;;  %v2680_v49 = vmul.f32 -1.442695, %v1406_v42 }
 0xd03   :  { %v3388_v44 = vpop.eup %3387 }
 0xd04   :  { %1416 = vrot.lane.b32.xlu0 %v3388_v44, %s3610_s30 }
 0xd06   :  { %v1572_v45 = vpop.f32.mrb[16].mxu1 }
 0xd07   :  { %v3296_v46 = vadd.f32 %v3894_v35, %v1572_v45  ;;  %v3019_v47 = vpop.f32.mrb[17].mxu1 }
 0xd09   :  { %3389 = vtanh.f32 %v3296_v46  ;;  %v2683_v52 = vmul.f32 -1.442695, %v3296_v46 }
 0xd0a   :  { %3391 = vpow2.f32 %v2680_v49 }
 0xd0b   :  { %3393 = vpow2.f32 %v2683_v52 }
 0xd13   :  { %v3390_v48 = vpop.eup %3389 }
 0xd14   :  { %1586 = vrot.lane.b32.xlu1 %v3390_v48, %s3610_s30  ;;  %v3392_v50 = vpop.eup %3391 }
 0xd15   :  { %v1410_v59 = vadd.f32 1.0, %v3392_v50  ;;  %v3394_v53 = vpop.eup %3393 }
 0xd16   :  { %v1580_v61 = vadd.f32 1.0, %v3394_v53 }
 0xd17   :  { %3395 = vrcp.f32 %v1410_v59 }
 0xd18   :  { %3397 = vrcp.f32 %v1580_v61 }
 0xd21   :  { %v3396_v54 = vpop.eup %3395 }
 0xd22   :  { %v3398_v0 = vpop.eup %3397  ;;  %v1414_v3 = vmul.f32 %v3396_v54, %v3985_v27 }
 0xd23   :  { %v1584_v9 = vmul.f32 %v3398_v0, %v3990_v57 }
 0xd76   :  { %v1417_v55 = vpop.permute.xlu0 %1416 }
 0xd77   :  { %v1419_v60 = vmul.f32 %v3396_v54, %v1417_v55 }
 0xd79   :  { %1421 = vrot.lane.b32.xlu0 %v1419_v60, %s3610_s30  ;;  %v397_v60 = vadd.f32 %v3828_v51, %v3848_v63 }
 0xd86   :  { %v1587_v1 = vpop.permute.xlu1 %1586 }
 0xd87   :  { %v1589_v2 = vmul.f32 %v3398_v0, %v1587_v1 }
 0xd89   :  { %1591 = vrot.lane.b32.xlu1 %v1589_v2, %s3610_s30 }
 0xdeb   :  { %v1422_v4 = vpop.permute.xlu0 %1421 }
 0xdec   :  { %v4025_v5 = vadd.f32 %v1422_v4, %v1414_v3 }
 0xdee   :  { %3399 = vtanh.f32 %v4025_v5 }
 0xdf8   :  { %v3400_v8 = vpop.eup %3399 }
 0xdf9   :  { %1427 = vrot.lane.b32.xlu0 %v3400_v8, %s3610_s30 }
 0xdfb   :  { %v1592_v10 = vpop.permute.xlu1 %1591 }
 0xdfc   :  { %v4030_v11 = vadd.f32 %v1592_v10, %v1584_v9 }
 0xdfe   :  { %3401 = vtanh.f32 %v4030_v11 }
 0xe08   :  { %v3402_v56 = vpop.eup %3401 }
 0xe09   :  { %1597 = vrot.lane.b32.xlu1 %v3402_v56, %s3610_s30 }
 0xe6b   :  { %v1428_v12 = vpop.permute.xlu0 %1427 }
 0xe6c   :  { %v1430_v13 = vmul.f32 %v3396_v54, %v1428_v12 }
 0xe6e   :  { %1602 = vrot.lane.b32.xlu0 %v1430_v13, %s3611_s16 }
 0xe7b   :  { %v1598_v14 = vpop.permute.xlu1 %1597 }
 0xe7c   :  { %v1600_v16 = vmul.f32 %v3398_v0, %v1598_v14 }
 0xe7e   :  { %1772 = vrot.lane.b32.xlu1 %v1600_v16, %s3611_s16 }
 0xee0   :  { %v1603_v18 = vpop.permute.xlu0 %1602 }
 0xee1   :  { %3029 = vmatmul.mubr.msk.f32.vlgmr.msra.gmra.mrb[16].mxu0 %vm275_vm2, %v1603_v18 }
 0xee2   :  { %3235 = vmatpush3.bf16.msra.mxu0 %v3854_v15  ;;  %3039 = vmatprep.mubr.msk.f32.mxu0 %vm3608_vm3, %v3609_v23 }
 0xee3   :  { %3236 = vmatprep.subr.bf16.mxu0 %v3607_v6 }
 0xee6   :  { %3238 = vmatpush3.bf16.msra.mxu0 %v3857_v17 }
 0xee7   :  { %3239 = vmatprep.subr.bf16.mxu0 %v3607_v6 }
 0xee9   :  { %3040 = vmatmul.mubr.msk.f32.vlgmr.msra.gmra.mrb[18].mxu0 %vm275_vm2, %v1603_v18 }
 0xeea   :  { %3241 = vmatpush3.bf16.msra.mxu0 %v3864_v25  ;;  %3050 = vmatprep.mubr.msk.f32.mxu0 %vm3608_vm3, %v3609_v23 }
 0xeeb   :  { %3242 = vmatprep.subr.bf16.mxu0 %v3607_v6 }
 0xeee   :  { %3244 = vmatpush3.bf16.msra.mxu0 %v3869_v29 }
 0xeef   :  { %3263 = vmatprep.subr.bf16.mxu0 %v3607_v6 }
 0xef0   :  { %v1773_v19 = vpop.permute.xlu1 %1772 }
 0xef1   :  { %3051 = vmatmul.mubr.msk.f32.vlgmr.msra.gmra.mrb[18].mxu0 %vm275_vm2, %v1773_v19 }
 0xef2   :  { %3265 = vmatpush3.bf16.msra.mxu0 %v3752_v7  ;;  %3094 = vmatprep.mubr.msk.f32.mxu0 %vm3608_vm3, %v3609_v23 }
 0xef3   :  { %3266 = vmatprep.subr.bf16.mxu0 %v3607_v6 }
 0xef6   :  { %3268 = vmatpush3.bf16.msra.mxu0 %v3795_v21 }
 0xef7   :  { %3269 = vmatprep.subr.bf16.mxu0 %v3607_v6 }
 0xfb4   :  { %v1672_v22 = vpop.f32.mrb[16].mxu0 }
 0xfb5   :  { %v1676_v24 = vadd.f32 %v1672_v22, %v392_v20  ;;  %v3030_v26 = vpop.f32.mrb[17].mxu0 }
 0xfb7   :  { %3403 = vtanh.f32 %v1676_v24  ;;  %v2685_v21 = vmul.f32 -1.442695, %v1676_v24 }
 0xfc1   :  { %v3404_v27 = vpop.eup %3403 }
 0xfc2   :  { %1686 = vrot.lane.b32.xlu0 %v3404_v27, %s3610_s30 }
 0xfc4   :  { %v1842_v7 = vpop.f32.mrb[18].mxu0 }
 0xfc5   :  { %v3297_v28 = vadd.f32 %v3894_v35, %v1842_v7  ;;  %v3052_v30 = vpop.f32.mrb[19].mxu0 }
 0xfc7   :  { %3405 = vtanh.f32 %v3297_v28  ;;  %v2688_v32 = vmul.f32 -1.442695, %v3297_v28 }
 0xfc8   :  { %3407 = vpow2.f32 %v2685_v21 }
 0xfc9   :  { %3409 = vpow2.f32 %v2688_v32 }
 0xfd1   :  { %v3406_v31 = vpop.eup %3405 }
 0xfd2   :  { %1856 = vrot.lane.b32.xlu1 %v3406_v31, %s3610_s30  ;;  %v3408_v57 = vpop.eup %3407 }
 0xfd3   :  { %v1680_v58 = vadd.f32 1.0, %v3408_v57  ;;  %v3410_v33 = vpop.eup %3409 }
 0xfd4   :  { %v1850_v38 = vadd.f32 1.0, %v3410_v33 }
 0xfd5   :  { %3411 = vrcp.f32 %v1680_v58 }
 0xfd6   :  { %3413 = vrcp.f32 %v1850_v38 }
 0xfdf   :  { %v3412_v34 = vpop.eup %3411 }
 0xfe0   :  { %v3414_v39 = vpop.eup %3413  ;;  %v1684_v42 = vmul.f32 %v3412_v34, %v4025_v5 }
 0xfe1   :  { %v1854_v46 = vmul.f32 %v3414_v39, %v4030_v11 }
0x1034   :  { %v1687_v36 = vpop.permute.xlu0 %1686 }
0x1035   :  { %v1689_v37 = vmul.f32 %v3412_v34, %v1687_v36 }
0x1037   :  { %1691 = vrot.lane.b32.xlu0 %v1689_v37, %s3610_s30 }
0x1044   :  { %v1857_v40 = vpop.permute.xlu1 %1856 }
0x1045   :  { %v1859_v41 = vmul.f32 %v3414_v39, %v1857_v40 }
0x1047   :  { %1861 = vrot.lane.b32.xlu1 %v1859_v41, %s3610_s30 }
0x10a9   :  { %v1692_v43 = vpop.permute.xlu0 %1691 }
0x10aa   :  { %v4065_v44 = vadd.f32 %v1692_v43, %v1684_v42 }
0x10ac   :  { %3415 = vtanh.f32 %v4065_v44 }
0x10b6   :  { %v3416_v45 = vpop.eup %3415 }
0x10b7   :  { %1697 = vrot.lane.b32.xlu0 %v3416_v45, %s3610_s30 }
0x10b9   :  { %v1862_v47 = vpop.permute.xlu1 %1861 }
0x10ba   :  { %v4070_v48 = vadd.f32 %v1862_v47, %v1854_v46 }
0x10bc   :  { %3417 = vtanh.f32 %v4070_v48 }
0x10c6   :  { %v3418_v49 = vpop.eup %3417 }
0x10c7   :  { %1867 = vrot.lane.b32.xlu1 %v3418_v49, %s3610_s30 }
0x1129   :  { %v1698_v50 = vpop.permute.xlu0 %1697 }
0x112a   :  { %v1700_v52 = vmul.f32 %v3412_v34, %v1698_v50  ;;  %v402_v34 = vadd.f32 %v3846_v62, %v3828_v51 }
0x112c   :  { %1872 = vrot.lane.b32.xlu0 %v1700_v52, %s3611_s16 }
0x1139   :  { %v1868_v59 = vpop.permute.xlu1 %1867 }
0x113a   :  { %v1870_v53 = vmul.f32 %v3414_v39, %v1868_v59 }
0x113c   :  { %2042 = vrot.lane.b32.xlu1 %v1870_v53, %s3611_s16 }
0x119e   :  { %v1873_v54 = vpop.permute.xlu0 %1872 }
0x119f   :  { %3062 = vmatmul.mubr.msk.f32.vlgmr.msra.gmra.mrb[18].mxu1 %vm275_vm2, %v1873_v54 }
0x11a0   :  { %3253 = vmatpush3.bf16.msra.mxu1 %v3854_v15  ;;  %3072 = vmatprep.mubr.msk.f32.mxu1 %vm3608_vm3, %v3609_v23 }
0x11a1   :  { %3254 = vmatprep.subr.bf16.mxu1 %v3607_v6 }
0x11a4   :  { %3256 = vmatpush3.bf16.msra.mxu1 %v3857_v17 }
0x11a5   :  { %3257 = vmatprep.subr.bf16.mxu1 %v3607_v6 }
0x11a7   :  { %3073 = vmatmul.mubr.msk.f32.vlgmr.msra.gmra.mrb[20].mxu1 %vm275_vm2, %v1873_v54 }
0x11a8   :  { %3259 = vmatpush3.bf16.msra.mxu1 %v3864_v25  ;;  %3083 = vmatprep.mubr.msk.f32.mxu1 %vm3608_vm3, %v3609_v23 }
0x11a9   :  { %3260 = vmatprep.subr.bf16.mxu1 %v3607_v6 }
0x11ac   :  { %3262 = vmatpush3.bf16.msra.mxu1 %v3869_v29 }
0x11ad   :  { %3281 = vmatprep.subr.bf16.mxu1 %v3607_v6 }
0x11ae   :  { %v2043_v55 = vpop.permute.xlu1 %2042 }
0x11af   :  { %3084 = vmatmul.mubr.msk.f32.vlgmr.msra.gmra.mrb[20].mxu1 %vm275_vm2, %v2043_v55 }
0x11b0   :  { %3283 = vmatpush3.bf16.msra.mxu1 %v3854_v15  ;;  %3127 = vmatprep.mubr.msk.f32.mxu1 %vm3608_vm3, %v3609_v23 }
0x11b1   :  { %3284 = vmatprep.subr.bf16.mxu1 %v3607_v6 }
0x11b4   :  { %3286 = vmatpush3.bf16.msra.mxu1 %v3857_v17 }
0x11b5   :  { %3287 = vmatprep.subr.bf16.mxu1 %v3607_v6 }
0x1272   :  { %v1942_v61 = vpop.f32.mrb[18].mxu1 }
0x1273   :  { %v1946_v0 = vadd.f32 %v1942_v61, %v397_v60  ;;  %v3063_v1 = vpop.f32.mrb[19].mxu1 }
0x1275   :  { %3419 = vtanh.f32 %v1946_v0  ;;  %v2690_v9 = vmul.f32 -1.442695, %v1946_v0 }
0x127f   :  { %v3420_v2 = vpop.eup %3419 }
0x1280   :  { %1956 = vrot.lane.b32.xlu0 %v3420_v2, %s3610_s30 }
0x1282   :  { %v2112_v3 = vpop.f32.mrb[20].mxu1 }
0x1283   :  { %v3298_v4 = vadd.f32 %v3894_v35, %v2112_v3  ;;  %v3085_v5 = vpop.f32.mrb[21].mxu1 }
0x1285   :  { %3421 = vtanh.f32 %v3298_v4  ;;  %v2693_v11 = vmul.f32 -1.442695, %v3298_v4 }
0x1286   :  { %3423 = vpow2.f32 %v2690_v9 }
0x1287   :  { %3425 = vpow2.f32 %v2693_v11 }
0x128f   :  { %v3422_v8 = vpop.eup %3421 }
0x1290   :  { %2126 = vrot.lane.b32.xlu1 %v3422_v8, %s3610_s30  ;;  %v3424_v10 = vpop.eup %3423 }
0x1291   :  { %v1950_v63 = vadd.f32 1.0, %v3424_v10  ;;  %v3426_v56 = vpop.eup %3425 }
0x1292   :  { %v2120_v16 = vadd.f32 1.0, %v3426_v56 }
0x1293   :  { %3427 = vrcp.f32 %v1950_v63 }
0x1294   :  { %3429 = vrcp.f32 %v2120_v16 }
0x129d   :  { %v3428_v12 = vpop.eup %3427 }
0x129e   :  { %v3430_v18 = vpop.eup %3429  ;;  %v1954_v22 = vmul.f32 %v3428_v12, %v4065_v44 }
0x129f   :  { %v2124_v7 = vmul.f32 %v3430_v18, %v4070_v48 }
0x12f2   :  { %v1957_v13 = vpop.permute.xlu0 %1956 }
0x12f3   :  { %v1959_v14 = vmul.f32 %v3428_v12, %v1957_v13 }
0x12f5   :  { %1961 = vrot.lane.b32.xlu0 %v1959_v14, %s3610_s30 }
0x1302   :  { %v2127_v19 = vpop.permute.xlu1 %2126 }
0x1303   :  { %v2129_v20 = vmul.f32 %v3430_v18, %v2127_v19 }
0x1305   :  { %2131 = vrot.lane.b32.xlu1 %v2129_v20, %s3610_s30 }
0x1367   :  { %v1962_v24 = vpop.permute.xlu0 %1961 }
0x1368   :  { %v1964_v26 = vadd.f32 %v1962_v24, %v1954_v22 }
0x136a   :  { %3431 = vtanh.f32 %v1964_v26 }
0x1374   :  { %v3432_v27 = vpop.eup %3431 }
0x1375   :  { %1967 = vrot.lane.b32.xlu0 %v3432_v27, %s3610_s30 }
0x1377   :  { %v2132_v28 = vpop.permute.xlu1 %2131 }
0x1378   :  { %v2134_v30 = vadd.f32 %v2132_v28, %v2124_v7 }
0x137a   :  { %3433 = vtanh.f32 %v2134_v30 }
0x1384   :  { %v3434_v31 = vpop.eup %3433 }
0x1385   :  { %2137 = vrot.lane.b32.xlu1 %v3434_v31, %s3610_s30 }
0x13e7   :  { %v1968_v21 = vpop.permute.xlu0 %1967 }
0x13e8   :  { %v1970_v57 = vmul.f32 %v3428_v12, %v1968_v21 }
0x13ea   :  { %2142 = vrot.lane.b32.xlu0 %v1970_v57, %s3611_s16 }
0x13f7   :  { %v2138_v32 = vpop.permute.xlu1 %2137 }
0x13f8   :  { %v2140_v58 = vmul.f32 %v3430_v18, %v2138_v32 }
0x13fa   :  { %2322 = vrot.lane.b32.xlu1 %v2140_v58, %s3611_s16 }
0x145c   :  { %v2143_v33 = vpop.permute.xlu0 %2142 }
0x145d   :  { %3095 = vmatmul.mubr.msk.f32.vlgmr.msra.gmra.mrb[20].mxu0 %vm275_vm2, %v2143_v33 }
0x145e   :  { %3271 = vmatpush3.bf16.msra.mxu0 %v3854_v15  ;;  %3105 = vmatprep.mubr.msk.f32.mxu0 %vm3608_vm3, %v3609_v23 }
0x145f   :  { %3272 = vmatprep.subr.bf16.mxu0 %v3607_v6 }
0x1462   :  { %3274 = vmatpush3.bf16.msra.mxu0 %v3857_v17 }
0x1463   :  { %3275 = vmatprep.subr.bf16.mxu0 %v3607_v6 }
0x1465   :  { %3106 = vmatmul.mubr.msk.f32.vlgmr.msra.gmra.mrb[22].mxu0 %vm275_vm2, %v2143_v33 }
0x1466   :  { %3277 = vmatpush3.bf16.msra.mxu0 %v3864_v25  ;;  %3116 = vmatprep.mubr.msk.f32.mxu0 %vm3608_vm3, %v3609_v23 }
0x1467   :  { %3278 = vmatprep.subr.bf16.mxu0 %v3607_v6 }
0x146a   :  { %3280 = vmatpush3.bf16.msra.mxu0 %v3869_v29 }
0x146c   :  { %v2323_v15 = vpop.permute.xlu1 %2322 }
0x146d   :  { %3117 = vmatmul.mubr.msk.f32.vlgmr.msra.gmra.mrb[22].mxu0 %vm275_vm2, %v2323_v15 }
0x1530   :  { %v2212_v17 = vpop.f32.mrb[20].mxu0 }
0x1531   :  { %v2216_v36 = vadd.f32 %v2212_v17, %v402_v34  ;;  %v3096_v37 = vpop.f32.mrb[21].mxu0 }
0x1533   :  { %3435 = vtanh.f32 %v2216_v36  ;;  %v2695_v43 = vmul.f32 -1.442695, %v2216_v36 }
0x153d   :  { %v3436_v38 = vpop.eup %3435 }
0x153e   :  { %2226 = vrot.lane.b32.xlu0 %v3436_v38, %s3610_s30 }
0x1540   :  { %v2392_v39 = vpop.f32.mrb[22].mxu0 }
0x1541   :  { %v3299_v40 = vadd.f32 %v3894_v35, %v2392_v39  ;;  %v3118_v41 = vpop.f32.mrb[23].mxu0 }
0x1543   :  { %3437 = vtanh.f32 %v3299_v40  ;;  %v2698_v45 = vmul.f32 -1.442695, %v3299_v40 }
0x1544   :  { %3439 = vpow2.f32 %v2695_v43 }
0x1545   :  { %3441 = vpow2.f32 %v2698_v45 }
0x154d   :  { %v3438_v42 = vpop.eup %3437 }
0x154e   :  { %2406 = vrot.lane.b32.xlu1 %v3438_v42, %s3610_s30  ;;  %v3440_v44 = vpop.eup %3439 }
0x154f   :  { %v2220_v51 = vadd.f32 1.0, %v3440_v44  ;;  %v3442_v62 = vpop.eup %3441 }
0x1550   :  { %v2400_v49 = vadd.f32 1.0, %v3442_v62 }
0x1551   :  { %3443 = vrcp.f32 %v2220_v51 }
0x1552   :  { %3445 = vrcp.f32 %v2400_v49 }
0x155b   :  { %v3444_v46 = vpop.eup %3443 }
0x155c   :  { %v3446_v50 = vpop.eup %3445  ;;  %v2224_v53 = vmul.f32 %v3444_v46, %v1964_v26 }
0x155d   :  { %v2404_v61 = vmul.f32 %v3446_v50, %v2134_v30 }
0x15b0   :  { %v2227_v47 = vpop.permute.xlu0 %2226 }
0x15b1   :  { %v2229_v48 = vmul.f32 %v3444_v46, %v2227_v47 }
0x15b3   :  { %2231 = vrot.lane.b32.xlu0 %v2229_v48, %s3610_s30 }
0x15c0   :  { %v2407_v52 = vpop.permute.xlu1 %2406 }
0x15c1   :  { %v2409_v59 = vmul.f32 %v3446_v50, %v2407_v52 }
0x15c3   :  { %2411 = vrot.lane.b32.xlu1 %v2409_v59, %s3610_s30 }
0x1625   :  { %v2232_v54 = vpop.permute.xlu0 %2231 }
0x1626   :  { %v2234_v55 = vadd.f32 %v2232_v54, %v2224_v53 }
0x1628   :  { %3447 = vtanh.f32 %v2234_v55 }
0x1632   :  { %v3448_v60 = vpop.eup %3447 }
0x1633   :  { %2237 = vrot.lane.b32.xlu0 %v3448_v60, %s3610_s30 }
0x1635   :  { %v2412_v0 = vpop.permute.xlu1 %2411 }
0x1636   :  { %v2414_v1 = vadd.f32 %v2412_v0, %v2404_v61 }
0x1638   :  { %3449 = vtanh.f32 %v2414_v1 }
0x1642   :  { %v3450_v2 = vpop.eup %3449 }
0x1643   :  { %2417 = vrot.lane.b32.xlu1 %v3450_v2, %s3610_s30 }
0x16a5   :  { %v2238_v3 = vpop.permute.xlu0 %2237 }
0x16a6   :  { %v2240_v4 = vmul.f32 %v3444_v46, %v2238_v3 }
0x16a8   :  { %2242 = vrot.lane.b32.xlu0 %v2240_v4, %s3611_s16 }
0x16b5   :  { %v2418_v5 = vpop.permute.xlu1 %2417 }
0x16b6   :  { %v2420_v8 = vmul.f32 %v3446_v50, %v2418_v5 }
0x16b8   :  { %2494 = vrot.lane.b32.xlu1 %v2420_v8, %s3611_s16 }
0x171a   :  { %v2243_v9 = vpop.permute.xlu0 %2242 }
0x171b   :  { %2245 = vst.msk [vmem:[#allocation10] sm:$0xff] %vm275_vm2, %v2243_v9  ;;  %3128 = vmatmul.mubr.msk.f32.vlgmr.msra.gmra.mrb[22].mxu1 %vm275_vm2, %v2243_v9 }
0x171c   :  { %3289 = vmatpush3.bf16.msra.mxu1 %v3864_v25  ;;  %3138 = vmatprep.mubr.msk.f32.mxu1 %vm3608_vm3, %v3609_v23 }
0x171d   :  { %3290 = vmatprep.subr.bf16.mxu1 %v3607_v6 }
0x1720   :  { %3292 = vmatpush3.bf16.msra.mxu1 %v3869_v29 }
0x172a   :  { %v2495_v10 = vpop.permute.xlu1 %2494 }
0x172b   :  { %3139 = vmatmul.mubr.msk.f32.vlgmr.msra.gmra.mrb[22].mxu1 %vm275_vm2, %v2495_v10 }
0x17fe   :  { %v2564_v11 = vpop.f32.mrb[22].mxu1 }
0x17ff   :  { %v3300_v63 = vadd.f32 %v3894_v35, %v2564_v11  ;;  %v3140_v56 = vpop.f32.mrb[23].mxu1 }
0x1801   :  { %3451 = vtanh.f32 %v3300_v63  ;;  %v2701_v13 = vmul.f32 -1.442695, %v3300_v63 }
0x1803   :  { %3453 = vpow2.f32 %v2701_v13 }
0x180b   :  { %v3452_v12 = vpop.eup %3451 }
0x180c   :  { %2578 = vrot.lane.b32.xlu0 %v3452_v12, %s3610_s30 }
0x180d   :  { %v3454_v25 = vpop.eup %3453 }
0x180e   :  { %v2572_v14 = vadd.f32 1.0, %v3454_v25 }
0x1810   :  { %3455 = vrcp.f32 %v2572_v14 }
0x181a   :  { %v3456_v23 = vpop.eup %3455 }
0x181b   :  { %v2576_v29 = vmul.f32 %v3456_v23, %v2414_v1 }
0x187e   :  { %v2579_v6 = vpop.permute.xlu0 %2578 }
0x187f   :  { %v2581_v16 = vmul.f32 %v3456_v23, %v2579_v6 }
0x1881   :  { %2583 = vrot.lane.b32.xlu1 %v2581_v16, %s3610_s30 }
0x1885   :  { %2247 = vrot.lane.b32.xlu1 %v2234_v55, %s3612_s10 }
0x18f3   :  { %v2584_v18 = vpop.permute.xlu1 %2583 }
0x18f4   :  { %v2586_v35 = vadd.f32 %v2584_v18, %v2576_v29 }
0x18f6   :  { %3457 = vtanh.f32 %v2586_v35  ;;  %2600 = vrot.lane.b32.xlu1 %v2586_v35, %s3612_s10 }
0x18f7   :  { %v2248_v19 = vpop.permute.xlu1 %2247 }
0x18f8   :  { %2250 = vst.msk [vmem:[#allocation11] sm:$0xff] %vm275_vm2, %v2248_v19 }
0x1900   :  { %v3458_v20 = vpop.eup %3457 }
0x1901   :  { %2589 = vrot.lane.b32.xlu0 %v3458_v20, %s3610_s30 }
0x1968   :  { %v2601_v22 = vpop.permute.xlu1 %2600 }
0x1969   :  { %2604 = vst.msk [vmem:[#allocation11 + $0x8] sm:$0xff] %vm275_vm2, %v2601_v22 }
0x196a   :  { %3558 = shalt.err (!%p3555_p8)
}
0x196b   :  { %s3559_s1 = scalar_lea.hbm %s4193_s12, 256 }
0x196c   :  { %p3560_p9 = scmp.ne.s32.totalorder %s4193_s12, %s3559_s1  ;;  %p3563_p10 = scmp.lt.u32.totalorder %s3559_s1, %s4193_s12 }
0x196e   :  { %p3565_p11 = pnand %p3563_p10, %p3560_p9 }
0x1970   :  { %3568 = shalt.err (!%p3565_p11)
}
0x1971   :  { %2628 = dma.vmem_to_hbm [thread:$0]  %s2623_s21, 256, %s4193_s12, [#allocation12], %s3602_s13, %s3602_s13, %s3603_s14  }
0x1972   :  { %s3614_s6 = smov [#allocation10]  }
0x1973   :  { %v2590_v24 = vpop.permute.xlu0 %2589  ;;  %s2610_s0 = sshll.u32 %s3614_s6, 4  ;;  %s2611_s0 = int_to_ptr.vmem [resolvable:$true] %s2610_s0 }
0x1974   :  { %v2592_v26 = vmul.f32 %v3456_v23, %v2590_v24  ;;  %s3569_s4 = scalar_lea.vmem %s2611_s0, 256  ;;  %p3574_p13 = scmp.lt.s32.totalorder %s2611_s0, %s2611_s0 }
0x1975   :  { %p3570_p12 = scmp.ne.s32.totalorder %s2611_s0, %s3569_s4  ;;  %p3575_p0 = scmp.lt.s32.totalorder %s3569_s4, %s3569_s4 }
0x1976   :  { %2594 = vrot.lane.b32.xlu0 %v2592_v26, %s3611_s16 }
0x1977   :  { %p3576_p1 = por %p3575_p0, %p3574_p13 }
0x1979   :  { %p3577_p2 = pnand %p3576_p1, %p3570_p12 }
0x19e8   :  { %v2595_v27 = vpop.permute.xlu0 %2594 }
0x19e9   :  { %2598 = vst.msk [vmem:[#allocation10 + $0x8] sm:$0xff] %vm275_vm2, %v2595_v27 }
0x19ea   :  { %3580 = shalt.err (!%p3577_p2)
}
0x19eb   :  { %s3581_s12 = scalar_lea.hbm %s4192_s11, 256 }
0x19ec   :  { %p3582_p3 = scmp.ne.s32.totalorder %s4192_s11, %s3581_s12  ;;  %p3585_p4 = scmp.lt.u32.totalorder %s3581_s12, %s4192_s11 }
0x19ee   :  { %p3587_p5 = pnand %p3585_p4, %p3582_p3 }
0x19f0   :  { %3590 = shalt.err (!%p3587_p5)
}
0x19f1   :  { %2616 = dma.vmem_to_hbm [thread:$0]  %s2611_s0, 256, %s4192_s11, [#allocation4], %s3602_s13, %s3602_s13, %s3603_s14  }
0x19f2   :  { %3597 = dma.done.wait [#allocation4], 256  }
0x19f3   :  { %3598 = vsyncadd [#allocation4], 4294967040 }
0x19f4   :  { %3599 = dma.done.wait [#allocation12], 256  }
0x19f5   :  { %3600 = vsyncadd [#allocation12], 4294967040 }
0x19f6   :  { %2635 = vsyncpa [#allocation3], 1 }
0x19f7   :  { %2636 = vsyncpa [#allocation6], 1 }
0x19f8   :  { %2637 = vsyncpa [#allocation9], 1 }
0x19f9   :  { %2638 = vsyncpa [#allocation4], 1 }
0x19fa   :  { %2639 = vsyncpa [#allocation12], 1 }

</bundles_post_ra>
